<compile_context>
chip_gen: v7x
topology: tpu7x:2x2x1
jax: 0.10.0
libtpu: 0.0.40
codegen_flags: <defaults>
</compile_context>

<pallas_src>
import jax
import jax.numpy as jnp
from jax.experimental import pallas as pl
from jax.experimental.pallas import tpu as pltpu


def _multimodal_loss_kernel(traj_ref, pred_ref, conf_ref, mask_ref,
                            min_traj_ref, part_ref):
    # traj_ref: (M, FD, T)  pred_ref: (FD, T)  conf_ref: (M, T)  mask_ref: (1, T)
    M, FD, T = traj_ref.shape

    pred = pred_ref[...].astype(jnp.float32)        # (FD, T)
    conf = conf_ref[...].astype(jnp.float32)        # (M, T)
    mask = mask_ref[...].astype(jnp.float32)        # (1, T)
    inv_fd = 1.0 / FD

    best_loss = None   # (1, T)
    best_conf = None   # (1, T)  logit of the current best modality
    best_traj = None   # (FD, T)

    # Unrolled loop over modalities: single pass over the traj tile, running
    # min keeps first-occurrence argmin semantics (strict '<'), same as torch.
    for m in range(M):
        t_m = traj_ref[m].astype(jnp.float32)        # (FD, T)
        diff = t_m - pred
        ad = jnp.abs(diff)
        huber = jnp.where(ad < 1.0, 0.5 * diff * diff, ad - 0.5)
        loss_m = jnp.sum(huber, axis=0, keepdims=True) * inv_fd   # (1, T)
        c_m = conf[m:m + 1, :]                       # (1, T)
        if m == 0:
            best_loss, best_conf, best_traj = loss_m, c_m, t_m
        else:
            better = loss_m < best_loss              # (1, T)
            best_loss = jnp.where(better, loss_m, best_loss)
            best_conf = jnp.where(better, c_m, best_conf)
            best_traj = jnp.where(better, t_m, best_traj)   # (1,T) bcast (FD,T)

    # CrossEntropyLoss(reduction='none') on logits: lse over M (sublane reduce).
    cmax = jnp.max(conf, axis=0, keepdims=True)                       # (1, T)
    lse = jnp.log(jnp.sum(jnp.exp(conf - cmax), axis=0, keepdims=True)) + cmax
    ce = lse - best_conf                                              # (1, T)

    min_traj_ref[...] = best_traj.astype(min_traj_ref.dtype)

    traj_sum = jnp.sum(best_loss * mask)
    ce_sum = jnp.sum(ce * mask)
    mask_sum = jnp.sum(mask)

    # Per-tile partial sums in a lane-padded (8,128) block:
    #   [0,0]=sum(min_loss*mask)  [0,1]=sum(ce*mask)  [0,2]=sum(mask)
    row = jax.lax.broadcasted_iota(jnp.int32, (8, 128), 0)
    lane = jax.lax.broadcasted_iota(jnp.int32, (8, 128), 1)
    part = (jnp.where((row == 0) & (lane == 0), traj_sum, 0.0)
            + jnp.where((row == 0) & (lane == 1), ce_sum, 0.0)
            + jnp.where((row == 0) & (lane == 2), mask_sum, 0.0))
    part_ref[0] = part


def multi_modal_loss_pallas(traj, confidence, predicted_future_traj,
                            predicted_traj_mask, *, tile_n=512):
    """Pallas implementation of MultiModalLoss.forward (lane-dense, tiled)."""
    B, O, M, F, D = traj.shape
    N, FD = B * O, F * D

    n_tiles = -(-N // tile_n)
    n_pad = n_tiles * tile_n
    pad = n_pad - N

    # Lane-dense layout: N on the last (lane) axis. Native dtype crosses the DMA.
    traj_t = jnp.transpose(traj.reshape(N, M, FD), (1, 2, 0))            # (M,FD,N)
    pred_t = jnp.transpose(predicted_future_traj.reshape(N, FD), (1, 0)) # (FD,N)
    conf_t = jnp.transpose(confidence.reshape(N, M), (1, 0))             # (M,N)
    mask_t = predicted_traj_mask.reshape(1, N)                           # (1,N)

    if pad:
        traj_t = jnp.pad(traj_t, ((0, 0), (0, 0), (0, pad)))
        pred_t = jnp.pad(pred_t, ((0, 0), (0, pad)))
        conf_t = jnp.pad(conf_t, ((0, 0), (0, pad)))
        mask_t = jnp.pad(mask_t, ((0, 0), (0, pad)))   # mask=0 => no contribution

    min_traj_t, partials = pl.pallas_call(
        _multimodal_loss_kernel,
        out_shape=(
            jax.ShapeDtypeStruct((FD, n_pad), traj.dtype),       # best-modal traj
            jax.ShapeDtypeStruct((n_tiles, 8, 128), jnp.float32),  # partial sums
        ),
        grid=(n_tiles,),
        in_specs=[
            pl.BlockSpec((M, FD, tile_n), lambda i: (0, 0, i)),
            pl.BlockSpec((FD, tile_n), lambda i: (0, i)),
            pl.BlockSpec((M, tile_n), lambda i: (0, i)),
            pl.BlockSpec((1, tile_n), lambda i: (0, i)),
        ],
        out_specs=(
            pl.BlockSpec((FD, tile_n), lambda i: (0, i)),
            pl.BlockSpec((1, 8, 128), lambda i: (i, 0, 0)),
        ),
        compiler_params=pltpu.CompilerParams(
            dimension_semantics=("parallel",)),   # megacore-shardable on v7x
    )(traj_t, pred_t, conf_t, mask_t)

    sums = jnp.sum(partials[:, 0, :3].astype(jnp.float32), axis=0)   # (3,)
    denom = sums[2] + 1e-5
    traj_loss = sums[0] / denom
    confidence_loss = sums[1] / denom

    # TODO(synk): torch's .squeeze() would also collapse B or O if either == 1;
    #             we always return (B, O, F, D).
    min_loss_traj = jnp.transpose(min_traj_t[:, :N], (1, 0)).reshape(B, O, F, D)
    return traj_loss, confidence_loss, min_loss_traj


def multi_modal_loss_ref(traj, confidence, pft, mask):
    """Pure-JAX reference mirroring the PyTorch module (for verification)."""
    diff = traj - pft[:, :, None, :, :]
    ad = jnp.abs(diff)
    huber = jnp.where(ad < 1.0, 0.5 * diff * diff, ad - 0.5)
    loss = huber.reshape(traj.shape[0], traj.shape[1], traj.shape[2], -1).mean(-1)
    min_loss = loss.min(-1)
    am = loss.argmin(-1)
    min_traj = jnp.take_along_axis(
        traj, am[:, :, None, None, None], axis=2)[:, :, 0]
    lse = jax.nn.logsumexp(confidence, axis=-1)
    sel = jnp.take_along_axis(confidence, am[..., None], axis=-1)[..., 0]
    ce = lse - sel
    denom = mask.sum() + 1e-5
    return (min_loss * mask).sum() / denom, (ce * mask).sum() / denom, min_traj


if __name__ == "__main__":
    # Small shapes implied by the forward:
    #   batch=2, obs_num=4, multimodal=6, future_step=8, output_dim=2
    B, O, M, F, D = 2, 4, 6, 8, 2
    key = jax.random.PRNGKey(0)
    k1, k2, k3, k4 = jax.random.split(key, 4)

    # Stand-ins for TrajDecoder / post-process outputs (source not provided).
    traj = jax.random.normal(k1, (B, O, M, F, D), dtype=jnp.float32)
    confidence = jax.random.normal(k2, (B, O, M), dtype=jnp.float32)
    predicted_future_traj = jax.random.normal(k3, (B, O, F, D), dtype=jnp.float32)
    predicted_traj_mask = (
        jax.random.uniform(k4, (B, O)) > 0.3).astype(jnp.float32)

    traj_loss, conf_loss, min_loss_traj = multi_modal_loss_pallas(
        traj, confidence, predicted_future_traj, predicted_traj_mask)
    jax.block_until_ready((traj_loss, conf_loss, min_loss_traj))

    # Verify against the pure-JAX reference.
    r_tl, r_cl, r_mt = multi_modal_loss_ref(
        traj, confidence, predicted_future_traj, predicted_traj_mask)
    assert jnp.allclose(traj_loss, r_tl, rtol=1e-5, atol=1e-5)
    assert jnp.allclose(conf_loss, r_cl, rtol=1e-5, atol=1e-5)
    assert jnp.allclose(min_loss_traj, r_mt, rtol=1e-5, atol=1e-5)

    print("KERNEL_OK")
</pallas_src>

<mosaic_0001>
module attributes {stable_mosaic.version = 11 : i64} {
  func.func @_multimodal_loss_kernel(%arg0: i32, %arg1: memref<6x16x512xf32, #tpu.memory_space<vmem>>, %arg2: memref<16x512xf32, #tpu.memory_space<vmem>>, %arg3: memref<6x512xf32, #tpu.memory_space<vmem>>, %arg4: memref<1x512xf32, #tpu.memory_space<vmem>>, %arg5: memref<16x512xf32, #tpu.memory_space<vmem>>, %arg6: memref<1x8x128xf32, #tpu.memory_space<vmem>>) attributes {dimension_semantics = [#tpu.dimension_semantics<parallel>], iteration_bounds = array<i64: 1>, scalar_prefetch = 0 : i64, scratch_operands = 0 : i64, tpu.core_type = #tpu.core_type<tc>, window_params = [{transform_indices = @transform_0, window_bounds = array<i64: 6, 16, 512>}, {transform_indices = @transform_1, window_bounds = array<i64: 16, 512>}, {transform_indices = @transform_2, window_bounds = array<i64: 6, 512>}, {transform_indices = @transform_3, window_bounds = array<i64: 1, 512>}, {transform_indices = @transform_4, window_bounds = array<i64: 16, 512>}, {transform_indices = @transform_5, window_bounds = array<i64: 1, 8, 128>}]} {
    %c0 = arith.constant 0 : index
    %c0_0 = arith.constant 0 : index
    %0 = vector.load %arg2[%c0, %c0_0] : memref<16x512xf32, #tpu.memory_space<vmem>>, vector<16x512xf32>
    %c0_1 = arith.constant 0 : index
    %c0_2 = arith.constant 0 : index
    %1 = vector.load %arg3[%c0_1, %c0_2] : memref<6x512xf32, #tpu.memory_space<vmem>>, vector<6x512xf32>
    %c0_3 = arith.constant 0 : index
    %c0_4 = arith.constant 0 : index
    %2 = vector.load %arg4[%c0_3, %c0_4] : memref<1x512xf32, #tpu.memory_space<vmem>>, vector<1x512xf32>
    %c0_5 = arith.constant 0 : index
    %c0_6 = arith.constant 0 : index
    %c0_7 = arith.constant 0 : index
    %3 = vector.load %arg1[%c0_5, %c0_6, %c0_7] : memref<6x16x512xf32, #tpu.memory_space<vmem>>, vector<1x16x512xf32>
    %4 = vector.shape_cast %3 : vector<1x16x512xf32> to vector<16x512xf32>
    %5 = arith.subf %4, %0 : vector<16x512xf32>
    %6 = math.absf %5 : vector<16x512xf32>
    %cst = arith.constant 1.000000e+00 : f32
    %7 = vector.broadcast %cst : f32 to vector<16x512xf32>
    %8 = arith.cmpf olt, %6, %7 : vector<16x512xf32>
    %cst_8 = arith.constant 5.000000e-01 : f32
    %9 = vector.broadcast %cst_8 : f32 to vector<16x512xf32>
    %10 = arith.mulf %9, %5 : vector<16x512xf32>
    %11 = arith.mulf %10, %5 : vector<16x512xf32>
    %cst_9 = arith.constant 5.000000e-01 : f32
    %12 = vector.broadcast %cst_9 : f32 to vector<16x512xf32>
    %13 = arith.subf %6, %12 : vector<16x512xf32>
    %14 = arith.select %8, %11, %13 : vector<16x512xi1>, vector<16x512xf32>
    %cst_10 = arith.constant dense<0.000000e+00> : vector<512xf32>
    %15 = vector.multi_reduction <add>, %14, %cst_10 [0] : vector<16x512xf32> to vector<512xf32>
    %16 = vector.shape_cast %15 : vector<512xf32> to vector<1x512xf32>
    %cst_11 = arith.constant 6.250000e-02 : f32
    %17 = vector.broadcast %cst_11 : f32 to vector<1x512xf32>
    %18 = arith.mulf %16, %17 : vector<1x512xf32>
    %19 = vector.extract_strided_slice %1 {offsets = [0, 0], sizes = [1, 512], strides = [1, 1]} : vector<6x512xf32> to vector<1x512xf32>
    %c1 = arith.constant 1 : index
    %c0_12 = arith.constant 0 : index
    %c0_13 = arith.constant 0 : index
    %20 = vector.load %arg1[%c1, %c0_12, %c0_13] : memref<6x16x512xf32, #tpu.memory_space<vmem>>, vector<1x16x512xf32>
    %21 = vector.shape_cast %20 : vector<1x16x512xf32> to vector<16x512xf32>
    %22 = arith.subf %21, %0 : vector<16x512xf32>
    %23 = math.absf %22 : vector<16x512xf32>
    %cst_14 = arith.constant 1.000000e+00 : f32
    %24 = vector.broadcast %cst_14 : f32 to vector<16x512xf32>
    %25 = arith.cmpf olt, %23, %24 : vector<16x512xf32>
    %cst_15 = arith.constant 5.000000e-01 : f32
    %26 = vector.broadcast %cst_15 : f32 to vector<16x512xf32>
    %27 = arith.mulf %26, %22 : vector<16x512xf32>
    %28 = arith.mulf %27, %22 : vector<16x512xf32>
    %cst_16 = arith.constant 5.000000e-01 : f32
    %29 = vector.broadcast %cst_16 : f32 to vector<16x512xf32>
    %30 = arith.subf %23, %29 : vector<16x512xf32>
    %31 = arith.select %25, %28, %30 : vector<16x512xi1>, vector<16x512xf32>
    %cst_17 = arith.constant dense<0.000000e+00> : vector<512xf32>
    %32 = vector.multi_reduction <add>, %31, %cst_17 [0] : vector<16x512xf32> to vector<512xf32>
    %33 = vector.shape_cast %32 : vector<512xf32> to vector<1x512xf32>
    %cst_18 = arith.constant 6.250000e-02 : f32
    %34 = vector.broadcast %cst_18 : f32 to vector<1x512xf32>
    %35 = arith.mulf %33, %34 : vector<1x512xf32>
    %36 = vector.extract_strided_slice %1 {offsets = [1, 0], sizes = [1, 512], strides = [1, 1]} : vector<6x512xf32> to vector<1x512xf32>
    %37 = arith.cmpf olt, %35, %18 : vector<1x512xf32>
    %38 = arith.select %37, %35, %18 : vector<1x512xi1>, vector<1x512xf32>
    %39 = arith.select %37, %36, %19 : vector<1x512xi1>, vector<1x512xf32>
    %40 = vector.shape_cast %37 : vector<1x512xi1> to vector<1x512xi1>
    %41 = vector.broadcast %40 : vector<1x512xi1> to vector<16x512xi1>
    %42 = arith.select %41, %21, %4 : vector<16x512xi1>, vector<16x512xf32>
    %c2 = arith.constant 2 : index
    %c0_19 = arith.constant 0 : index
    %c0_20 = arith.constant 0 : index
    %43 = vector.load %arg1[%c2, %c0_19, %c0_20] : memref<6x16x512xf32, #tpu.memory_space<vmem>>, vector<1x16x512xf32>
    %44 = vector.shape_cast %43 : vector<1x16x512xf32> to vector<16x512xf32>
    %45 = arith.subf %44, %0 : vector<16x512xf32>
    %46 = math.absf %45 : vector<16x512xf32>
    %cst_21 = arith.constant 1.000000e+00 : f32
    %47 = vector.broadcast %cst_21 : f32 to vector<16x512xf32>
    %48 = arith.cmpf olt, %46, %47 : vector<16x512xf32>
    %cst_22 = arith.constant 5.000000e-01 : f32
    %49 = vector.broadcast %cst_22 : f32 to vector<16x512xf32>
    %50 = arith.mulf %49, %45 : vector<16x512xf32>
    %51 = arith.mulf %50, %45 : vector<16x512xf32>
    %cst_23 = arith.constant 5.000000e-01 : f32
    %52 = vector.broadcast %cst_23 : f32 to vector<16x512xf32>
    %53 = arith.subf %46, %52 : vector<16x512xf32>
    %54 = arith.select %48, %51, %53 : vector<16x512xi1>, vector<16x512xf32>
    %cst_24 = arith.constant dense<0.000000e+00> : vector<512xf32>
    %55 = vector.multi_reduction <add>, %54, %cst_24 [0] : vector<16x512xf32> to vector<512xf32>
    %56 = vector.shape_cast %55 : vector<512xf32> to vector<1x512xf32>
    %cst_25 = arith.constant 6.250000e-02 : f32
    %57 = vector.broadcast %cst_25 : f32 to vector<1x512xf32>
    %58 = arith.mulf %56, %57 : vector<1x512xf32>
    %59 = vector.extract_strided_slice %1 {offsets = [2, 0], sizes = [1, 512], strides = [1, 1]} : vector<6x512xf32> to vector<1x512xf32>
    %60 = arith.cmpf olt, %58, %38 : vector<1x512xf32>
    %61 = arith.select %60, %58, %38 : vector<1x512xi1>, vector<1x512xf32>
    %62 = arith.select %60, %59, %39 : vector<1x512xi1>, vector<1x512xf32>
    %63 = vector.shape_cast %60 : vector<1x512xi1> to vector<1x512xi1>
    %64 = vector.broadcast %63 : vector<1x512xi1> to vector<16x512xi1>
    %65 = arith.select %64, %44, %42 : vector<16x512xi1>, vector<16x512xf32>
    %c3 = arith.constant 3 : index
    %c0_26 = arith.constant 0 : index
    %c0_27 = arith.constant 0 : index
    %66 = vector.load %arg1[%c3, %c0_26, %c0_27] : memref<6x16x512xf32, #tpu.memory_space<vmem>>, vector<1x16x512xf32>
    %67 = vector.shape_cast %66 : vector<1x16x512xf32> to vector<16x512xf32>
    %68 = arith.subf %67, %0 : vector<16x512xf32>
    %69 = math.absf %68 : vector<16x512xf32>
    %cst_28 = arith.constant 1.000000e+00 : f32
    %70 = vector.broadcast %cst_28 : f32 to vector<16x512xf32>
    %71 = arith.cmpf olt, %69, %70 : vector<16x512xf32>
    %cst_29 = arith.constant 5.000000e-01 : f32
    %72 = vector.broadcast %cst_29 : f32 to vector<16x512xf32>
    %73 = arith.mulf %72, %68 : vector<16x512xf32>
    %74 = arith.mulf %73, %68 : vector<16x512xf32>
    %cst_30 = arith.constant 5.000000e-01 : f32
    %75 = vector.broadcast %cst_30 : f32 to vector<16x512xf32>
    %76 = arith.subf %69, %75 : vector<16x512xf32>
    %77 = arith.select %71, %74, %76 : vector<16x512xi1>, vector<16x512xf32>
    %cst_31 = arith.constant dense<0.000000e+00> : vector<512xf32>
    %78 = vector.multi_reduction <add>, %77, %cst_31 [0] : vector<16x512xf32> to vector<512xf32>
    %79 = vector.shape_cast %78 : vector<512xf32> to vector<1x512xf32>
    %cst_32 = arith.constant 6.250000e-02 : f32
    %80 = vector.broadcast %cst_32 : f32 to vector<1x512xf32>
    %81 = arith.mulf %79, %80 : vector<1x512xf32>
    %82 = vector.extract_strided_slice %1 {offsets = [3, 0], sizes = [1, 512], strides = [1, 1]} : vector<6x512xf32> to vector<1x512xf32>
    %83 = arith.cmpf olt, %81, %61 : vector<1x512xf32>
    %84 = arith.select %83, %81, %61 : vector<1x512xi1>, vector<1x512xf32>
    %85 = arith.select %83, %82, %62 : vector<1x512xi1>, vector<1x512xf32>
    %86 = vector.shape_cast %83 : vector<1x512xi1> to vector<1x512xi1>
    %87 = vector.broadcast %86 : vector<1x512xi1> to vector<16x512xi1>
    %88 = arith.select %87, %67, %65 : vector<16x512xi1>, vector<16x512xf32>
    %c4 = arith.constant 4 : index
    %c0_33 = arith.constant 0 : index
    %c0_34 = arith.constant 0 : index
    %89 = vector.load %arg1[%c4, %c0_33, %c0_34] : memref<6x16x512xf32, #tpu.memory_space<vmem>>, vector<1x16x512xf32>
    %90 = vector.shape_cast %89 : vector<1x16x512xf32> to vector<16x512xf32>
    %91 = arith.subf %90, %0 : vector<16x512xf32>
    %92 = math.absf %91 : vector<16x512xf32>
    %cst_35 = arith.constant 1.000000e+00 : f32
    %93 = vector.broadcast %cst_35 : f32 to vector<16x512xf32>
    %94 = arith.cmpf olt, %92, %93 : vector<16x512xf32>
    %cst_36 = arith.constant 5.000000e-01 : f32
    %95 = vector.broadcast %cst_36 : f32 to vector<16x512xf32>
    %96 = arith.mulf %95, %91 : vector<16x512xf32>
    %97 = arith.mulf %96, %91 : vector<16x512xf32>
    %cst_37 = arith.constant 5.000000e-01 : f32
    %98 = vector.broadcast %cst_37 : f32 to vector<16x512xf32>
    %99 = arith.subf %92, %98 : vector<16x512xf32>
    %100 = arith.select %94, %97, %99 : vector<16x512xi1>, vector<16x512xf32>
    %cst_38 = arith.constant dense<0.000000e+00> : vector<512xf32>
    %101 = vector.multi_reduction <add>, %100, %cst_38 [0] : vector<16x512xf32> to vector<512xf32>
    %102 = vector.shape_cast %101 : vector<512xf32> to vector<1x512xf32>
    %cst_39 = arith.constant 6.250000e-02 : f32
    %103 = vector.broadcast %cst_39 : f32 to vector<1x512xf32>
    %104 = arith.mulf %102, %103 : vector<1x512xf32>
    %105 = vector.extract_strided_slice %1 {offsets = [4, 0], sizes = [1, 512], strides = [1, 1]} : vector<6x512xf32> to vector<1x512xf32>
    %106 = arith.cmpf olt, %104, %84 : vector<1x512xf32>
    %107 = arith.select %106, %104, %84 : vector<1x512xi1>, vector<1x512xf32>
    %108 = arith.select %106, %105, %85 : vector<1x512xi1>, vector<1x512xf32>
    %109 = vector.shape_cast %106 : vector<1x512xi1> to vector<1x512xi1>
    %110 = vector.broadcast %109 : vector<1x512xi1> to vector<16x512xi1>
    %111 = arith.select %110, %90, %88 : vector<16x512xi1>, vector<16x512xf32>
    %c5 = arith.constant 5 : index
    %c0_40 = arith.constant 0 : index
    %c0_41 = arith.constant 0 : index
    %112 = vector.load %arg1[%c5, %c0_40, %c0_41] : memref<6x16x512xf32, #tpu.memory_space<vmem>>, vector<1x16x512xf32>
    %113 = vector.shape_cast %112 : vector<1x16x512xf32> to vector<16x512xf32>
    %114 = arith.subf %113, %0 : vector<16x512xf32>
    %115 = math.absf %114 : vector<16x512xf32>
    %cst_42 = arith.constant 1.000000e+00 : f32
    %116 = vector.broadcast %cst_42 : f32 to vector<16x512xf32>
    %117 = arith.cmpf olt, %115, %116 : vector<16x512xf32>
    %cst_43 = arith.constant 5.000000e-01 : f32
    %118 = vector.broadcast %cst_43 : f32 to vector<16x512xf32>
    %119 = arith.mulf %118, %114 : vector<16x512xf32>
    %120 = arith.mulf %119, %114 : vector<16x512xf32>
    %cst_44 = arith.constant 5.000000e-01 : f32
    %121 = vector.broadcast %cst_44 : f32 to vector<16x512xf32>
    %122 = arith.subf %115, %121 : vector<16x512xf32>
    %123 = arith.select %117, %120, %122 : vector<16x512xi1>, vector<16x512xf32>
    %cst_45 = arith.constant dense<0.000000e+00> : vector<512xf32>
    %124 = vector.multi_reduction <add>, %123, %cst_45 [0] : vector<16x512xf32> to vector<512xf32>
    %125 = vector.shape_cast %124 : vector<512xf32> to vector<1x512xf32>
    %cst_46 = arith.constant 6.250000e-02 : f32
    %126 = vector.broadcast %cst_46 : f32 to vector<1x512xf32>
    %127 = arith.mulf %125, %126 : vector<1x512xf32>
    %128 = vector.extract_strided_slice %1 {offsets = [5, 0], sizes = [1, 512], strides = [1, 1]} : vector<6x512xf32> to vector<1x512xf32>
    %129 = arith.cmpf olt, %127, %107 : vector<1x512xf32>
    %130 = arith.select %129, %127, %107 : vector<1x512xi1>, vector<1x512xf32>
    %131 = arith.select %129, %128, %108 : vector<1x512xi1>, vector<1x512xf32>
    %132 = vector.shape_cast %129 : vector<1x512xi1> to vector<1x512xi1>
    %133 = vector.broadcast %132 : vector<1x512xi1> to vector<16x512xi1>
    %134 = arith.select %133, %113, %111 : vector<16x512xi1>, vector<16x512xf32>
    %cst_47 = arith.constant dense<0xFF800000> : vector<512xf32>
    %135 = vector.multi_reduction <maximumf>, %1, %cst_47 [0] : vector<6x512xf32> to vector<512xf32>
    %136 = vector.shape_cast %135 : vector<512xf32> to vector<1x512xf32>
    %137 = vector.broadcast %136 : vector<1x512xf32> to vector<6x512xf32>
    %138 = arith.subf %1, %137 : vector<6x512xf32>
    %139 = math.exp %138 : vector<6x512xf32>
    %cst_48 = arith.constant dense<0.000000e+00> : vector<512xf32>
    %140 = vector.multi_reduction <add>, %139, %cst_48 [0] : vector<6x512xf32> to vector<512xf32>
    %141 = vector.shape_cast %140 : vector<512xf32> to vector<1x512xf32>
    %142 = math.log %141 : vector<1x512xf32>
    %143 = arith.addf %142, %136 : vector<1x512xf32>
    %144 = arith.subf %143, %131 : vector<1x512xf32>
    %c0_49 = arith.constant 0 : index
    %c0_50 = arith.constant 0 : index
    %145 = vector.load %arg5[%c0_49, %c0_50] : memref<16x512xf32, #tpu.memory_space<vmem>>, vector<16x512xf32>
    tpu.vector_store %arg5[%c0_49, %c0_50], %134 {strides = array<i32>} : memref<16x512xf32, #tpu.memory_space<vmem>>, vector<16x512xf32>,
    %146 = arith.mulf %130, %2 : vector<1x512xf32>
    %147 = vector.shape_cast %146 : vector<1x512xf32> to vector<1x1x512xf32>
    %cst_51 = arith.constant dense<0.000000e+00> : vector<1xf32>
    %148 = vector.multi_reduction <add>, %147, %cst_51 [1, 2] : vector<1x1x512xf32> to vector<1xf32>
    %149 = vector.shape_cast %148 : vector<1xf32> to vector<1x1x1xf32>
    %150 = vector.extract %149[0, 0, 0] : f32 from vector<1x1x1xf32>
    %151 = arith.mulf %144, %2 : vector<1x512xf32>
    %152 = vector.shape_cast %151 : vector<1x512xf32> to vector<1x1x512xf32>
    %cst_52 = arith.constant dense<0.000000e+00> : vector<1xf32>
    %153 = vector.multi_reduction <add>, %152, %cst_52 [1, 2] : vector<1x1x512xf32> to vector<1xf32>
    %154 = vector.shape_cast %153 : vector<1xf32> to vector<1x1x1xf32>
    %155 = vector.extract %154[0, 0, 0] : f32 from vector<1x1x1xf32>
    %156 = vector.shape_cast %2 : vector<1x512xf32> to vector<1x1x512xf32>
    %cst_53 = arith.constant dense<0.000000e+00> : vector<1xf32>
    %157 = vector.multi_reduction <add>, %156, %cst_53 [1, 2] : vector<1x1x512xf32> to vector<1xf32>
    %158 = vector.shape_cast %157 : vector<1xf32> to vector<1x1x1xf32>
    %159 = vector.extract %158[0, 0, 0] : f32 from vector<1x1x1xf32>
    %160 = tpu.iota {dimensions = array<i32: 0>} : vector<8x128xi32>
    %161 = tpu.iota {dimensions = array<i32: 1>} : vector<8x128xi32>
    %c0_i32 = arith.constant 0 : i32
    %162 = vector.broadcast %c0_i32 : i32 to vector<8x128xi32>
    %163 = arith.cmpi eq, %160, %162 : vector<8x128xi32>
    %c0_i32_54 = arith.constant 0 : i32
    %164 = vector.broadcast %c0_i32_54 : i32 to vector<8x128xi32>
    %165 = arith.cmpi eq, %161, %164 : vector<8x128xi32>
    %166 = arith.andi %163, %165 : vector<8x128xi1>
    %cst_55 = arith.constant 0.000000e+00 : f32
    %167 = vector.broadcast %150 : f32 to vector<8x128xf32>
    %168 = vector.broadcast %cst_55 : f32 to vector<8x128xf32>
    %169 = arith.select %166, %167, %168 : vector<8x128xi1>, vector<8x128xf32>
    %c0_i32_56 = arith.constant 0 : i32
    %170 = vector.broadcast %c0_i32_56 : i32 to vector<8x128xi32>
    %171 = arith.cmpi eq, %160, %170 : vector<8x128xi32>
    %c1_i32 = arith.constant 1 : i32
    %172 = vector.broadcast %c1_i32 : i32 to vector<8x128xi32>
    %173 = arith.cmpi eq, %161, %172 : vector<8x128xi32>
    %174 = arith.andi %171, %173 : vector<8x128xi1>
    %cst_57 = arith.constant 0.000000e+00 : f32
    %175 = vector.broadcast %155 : f32 to vector<8x128xf32>
    %176 = vector.broadcast %cst_57 : f32 to vector<8x128xf32>
    %177 = arith.select %174, %175, %176 : vector<8x128xi1>, vector<8x128xf32>
    %178 = arith.addf %169, %177 : vector<8x128xf32>
    %c0_i32_58 = arith.constant 0 : i32
    %179 = vector.broadcast %c0_i32_58 : i32 to vector<8x128xi32>
    %180 = arith.cmpi eq, %160, %179 : vector<8x128xi32>
    %c2_i32 = arith.constant 2 : i32
    %181 = vector.broadcast %c2_i32 : i32 to vector<8x128xi32>
    %182 = arith.cmpi eq, %161, %181 : vector<8x128xi32>
    %183 = arith.andi %180, %182 : vector<8x128xi1>
    %cst_59 = arith.constant 0.000000e+00 : f32
    %184 = vector.broadcast %159 : f32 to vector<8x128xf32>
    %185 = vector.broadcast %cst_59 : f32 to vector<8x128xf32>
    %186 = arith.select %183, %184, %185 : vector<8x128xi1>, vector<8x128xf32>
    %187 = arith.addf %178, %186 : vector<8x128xf32>
    %c0_60 = arith.constant 0 : index
    %c0_61 = arith.constant 0 : index
    %c0_62 = arith.constant 0 : index
    %188 = vector.load %arg6[%c0_60, %c0_61, %c0_62] : memref<1x8x128xf32, #tpu.memory_space<vmem>>, vector<1x8x128xf32>
    %189 = vector.shape_cast %188 : vector<1x8x128xf32> to vector<8x128xf32>
    %190 = vector.shape_cast %187 : vector<8x128xf32> to vector<1x8x128xf32>
    tpu.vector_store %arg6[%c0_60, %c0_61, %c0_62], %190 {strides = array<i32>} : memref<1x8x128xf32, #tpu.memory_space<vmem>>, vector<1x8x128xf32>,
    return
  }
  func.func @transform_0(%arg0: i32) -> (i32, i32, i32) {
    %c0_i32 = arith.constant 0 : i32
    %c0_i32_0 = arith.constant 0 : i32
    %c0_i32_1 = arith.constant 0 : i32
    return %c0_i32, %c0_i32_0, %arg0 : i32, i32, i32
  }
  func.func @transform_1(%arg0: i32) -> (i32, i32) {
    %c0_i32 = arith.constant 0 : i32
    %c0_i32_0 = arith.constant 0 : i32
    return %c0_i32, %arg0 : i32, i32
  }
  func.func @transform_2(%arg0: i32) -> (i32, i32) {
    %c0_i32 = arith.constant 0 : i32
    %c0_i32_0 = arith.constant 0 : i32
    return %c0_i32, %arg0 : i32, i32
  }
  func.func @transform_3(%arg0: i32) -> (i32, i32) {
    %c0_i32 = arith.constant 0 : i32
    %c0_i32_0 = arith.constant 0 : i32
    return %c0_i32, %arg0 : i32, i32
  }
  func.func @transform_4(%arg0: i32) -> (i32, i32) {
    %c0_i32 = arith.constant 0 : i32
    %c0_i32_0 = arith.constant 0 : i32
    return %c0_i32, %arg0 : i32, i32
  }
  func.func @transform_5(%arg0: i32) -> (i32, i32, i32) {
    %c0_i32 = arith.constant 0 : i32
    %c0_i32_0 = arith.constant 0 : i32
    %c0_i32_1 = arith.constant 0 : i32
    return %arg0, %c0_i32, %c0_i32_0 : i32, i32, i32
  }
}

</mosaic_0001>

<bundles_post_ra>
// kernel: tpu_custom_call.1
= control target key start
LH: loop header
LB: loop body
LE: loop exit
PB: predicated region body
PF: predicated region fallthrough
CT: control target
= control target key end

     0   :  { %11 = vsyncpa [#allocation3], 0  ;;  %s2584_s0 = inlined_call_operand.hbm [shape: f32[6,16,512], index: 0, kind: input, shape index: {}]   ;;  %s2585_s1 = inlined_call_operand.hbm [shape: f32[16,512], index: 1, kind: input, shape index: {}]   ;;  %s2586_s2 = inlined_call_operand.hbm [shape: f32[6,512], index: 2, kind: input, shape index: {}]   ;;  %s2587_s3 = inlined_call_operand.vmem [shape: f32[1,512], index: 3, kind: input, shape index: {}]   ;;  %s2588_s4 = inlined_call_operand.hbm [shape: f32[16,512], index: 4, kind: output, shape index: {0}]   ;;  %s2589_s5 = inlined_call_operand.hbm [shape: f32[1,8,128], index: 5, kind: output, shape index: {1}]  }
   0x1   :  { %12 = vsyncpa [#allocation6], 0 }
   0x2   :  { %13 = vsyncpa [#allocation4], 0 }
   0x3   :  { %14 = vsyncpa [#allocation10], 0  ;;  %s1293_s18 = smov [#allocation5]   ;;  %s1294_s20 = smov [#allocation2]  }
   0x4   :  { %s32_s19 = sshll.u32 %s1293_s18, 4  ;;  %s20_s21 = sshll.u32 %s1294_s20, 4  ;;  %s33_s19 = int_to_ptr.vmem [resolvable:$true] %s32_s19  ;;  %s1330_s21 = int_to_ptr.vmem [resolvable:$true] %s20_s21 }
   0x5   :  { %s1175_s24 = scalar_lea.hbm %s2585_s1, 1024 }
   0x6   :  { %p1176_p0 = scmp.ne.s32.totalorder %s2585_s1, %s1175_s24  ;;  %p1179_p1 = scmp.lt.u32.totalorder %s1175_s24, %s2585_s1 }
   0x8   :  { %p1181_p2 = pnand %p1179_p1, %p1176_p0 }
   0xa   :  { %1184 = shalt.err (!%p1181_p2)
}
   0xb   :  { %s1185_s29 = scalar_lea.vmem %s33_s19, 1024  ;;  %p1190_p4 = scmp.lt.s32.totalorder %s33_s19, %s33_s19 }
   0xc   :  { %p1186_p3 = scmp.ne.s32.totalorder %s33_s19, %s1185_s29  ;;  %p1191_p5 = scmp.lt.s32.totalorder %s1185_s29, %s1185_s29 }
   0xe   :  { %p1192_p6 = por %p1191_p5, %p1190_p4 }
  0x10   :  { %p1193_p7 = pnand %p1192_p6, %p1186_p3 }
  0x12   :  { %1196 = shalt.err (!%p1193_p7)
}
  0x13   :  { %s1295_s30 = smov 512   ;;  %s1296_s6 = smov 32  }
  0x14   :  { %38 = dma.hbm_to_vmem [thread:$0]  %s2585_s1, 1024, %s33_s19, [#allocation6], %s1295_s30, %s1295_s30, %s1296_s6  }
  0x15   :  { %s1197_s11 = scalar_lea.hbm %s2584_s0, 6144 }
  0x16   :  { %p1198_p8 = scmp.ne.s32.totalorder %s2584_s0, %s1197_s11  ;;  %p1201_p9 = scmp.lt.u32.totalorder %s1197_s11, %s2584_s0 }
  0x18   :  { %p1203_p10 = pnand %p1201_p9, %p1198_p8 }
  0x1a   :  { %1206 = shalt.err (!%p1203_p10)
}
  0x1b   :  { %s1207_s16 = scalar_lea.vmem %s1330_s21, 6144  ;;  %p1212_p12 = scmp.lt.s32.totalorder %s1330_s21, %s1330_s21 }
  0x1c   :  { %p1208_p11 = scmp.ne.s32.totalorder %s1330_s21, %s1207_s16  ;;  %p1213_p13 = scmp.lt.s32.totalorder %s1207_s16, %s1207_s16 }
  0x1e   :  { %p1214_p0 = por %p1213_p13, %p1212_p12 }
  0x20   :  { %p1215_p1 = pnand %p1214_p0, %p1208_p11 }
  0x22   :  { %1218 = shalt.err (!%p1215_p1)
}
  0x23   :  { %26 = dma.hbm_to_vmem [thread:$0]  %s2584_s0, 6144, %s1330_s21, [#allocation3], %s1295_s30, %s1295_s30, %s1296_s6  }
  0x24   :  { %s1297_s18 = smov [#allocation7]   ;;  %s1219_s23 = scalar_lea.hbm %s2586_s2, 512 }
  0x25   :  { %s45_s19 = sshll.u32 %s1297_s18, 4  ;;  %p1220_p2 = scmp.ne.s32.totalorder %s2586_s2, %s1219_s23  ;;  %s46_s19 = int_to_ptr.vmem [resolvable:$true] %s45_s19 }
  0x26   :  { %p1223_p3 = scmp.lt.u32.totalorder %s1219_s23, %s2586_s2 }
  0x28   :  { %p1225_p4 = pnand %p1223_p3, %p1220_p2 }
  0x2a   :  { %1228 = shalt.err (!%p1225_p4)
}
  0x2b   :  { %s1229_s28 = scalar_lea.vmem %s46_s19, 512  ;;  %p1234_p6 = scmp.lt.s32.totalorder %s46_s19, %s46_s19 }
  0x2c   :  { %p1230_p5 = scmp.ne.s32.totalorder %s46_s19, %s1229_s28  ;;  %p1235_p7 = scmp.lt.s32.totalorder %s1229_s28, %s1229_s28 }
  0x2e   :  { %p1236_p8 = por %p1235_p7, %p1234_p6 }
  0x30   :  { %p1237_p9 = pnand %p1236_p8, %p1230_p5 }
  0x32   :  { %1240 = shalt.err (!%p1237_p9)
}
  0x33   :  { %48 = dma.hbm_to_vmem [thread:$0]  %s2586_s2, 512, %s46_s19, [#allocation6]  }
  0x34   :  { %1285 = dma.done.wait [#allocation3], 6144  }
  0x35   :  { %1286 = vsyncadd [#allocation3], 4294961152 }
  0x36   :  { %1287 = dma.done.wait [#allocation6], 1536  }
  0x37   :  { %1288 = vsyncadd [#allocation6], 4294965760  ;;  %v1379_v0 = vld [vmem:[#allocation5] sm:$0xff]  ;;  %v1381_v1 = vld [vmem:[#allocation5 + $0x8] sm:$0xff] }
  0x38   :  { %2687 = vst [vmem:[#allocation15_spill] sm:$0xff] %v1379_v0  ;;  %2688 = vst [vmem:[#allocation16_spill] sm:$0xff] %v1381_v1  ;;  %v1383_v2 = vld [vmem:[#allocation5 + $0x10] sm:$0xff]  ;;  %v1385_v3 = vld [vmem:[#allocation5 + $0x18] sm:$0xff] }
  0x39   :  { %2689 = vst [vmem:[#allocation17_spill] sm:$0xff] %v1383_v2  ;;  %2690 = vst [vmem:[#allocation18_spill] sm:$0xff] %v1385_v3  ;;  %v1387_v4 = vld [vmem:[#allocation5 + $0x20] sm:$0xff]  ;;  %v1389_v5 = vld [vmem:[#allocation5 + $0x28] sm:$0xff] }
  0x3a   :  { %2691 = vst [vmem:[#allocation19_spill] sm:$0xff] %v1387_v4  ;;  %2692 = vst [vmem:[#allocation20_spill] sm:$0xff] %v1389_v5  ;;  %v1391_v6 = vld [vmem:[#allocation5 + $0x30] sm:$0xff]  ;;  %v1393_v7 = vld [vmem:[#allocation5 + $0x38] sm:$0xff] }
  0x3b   :  { %2693 = vst [vmem:[#allocation21_spill] sm:$0xff] %v1391_v6  ;;  %2694 = vst [vmem:[#allocation22_spill] sm:$0xff] %v1393_v7  ;;  %v1395_v8 = vld [vmem:[#allocation2] sm:$0xff]  ;;  %v1397_v9 = vld [vmem:[#allocation2 + $0x8] sm:$0xff] }
  0x3c   :  { %2695 = vst [vmem:[#allocation23_spill] sm:$0xff] %v1395_v8  ;;  %2696 = vst [vmem:[#allocation24_spill] sm:$0xff] %v1397_v9  ;;  %v1399_v10 = vld [vmem:[#allocation2 + $0x10] sm:$0xff]  ;;  %v1401_v11 = vld [vmem:[#allocation2 + $0x18] sm:$0xff]  ;;  %v81_v13 = vsub.f32 %v1395_v8, %v1379_v0  ;;  %v82_v14 = vsub.f32 %v1397_v9, %v1381_v1 }
  0x3d   :  { %2697 = vst [vmem:[#allocation25_spill] sm:$0xff] %v1399_v10  ;;  %2698 = vst [vmem:[#allocation26_spill] sm:$0xff] %v1401_v11  ;;  %v1403_v12 = vld [vmem:[#allocation2 + $0x20] sm:$0xff]  ;;  %v1409_v15 = vld [vmem:[#allocation2 + $0x28] sm:$0xff]  ;;  %v83_v18 = vsub.f32 %v1399_v10, %v1383_v2  ;;  %v84_v19 = vsub.f32 %v1401_v11, %v1385_v3 }
  0x3e   :  { %2699 = vst [vmem:[#allocation27_spill] sm:$0xff] %v1403_v12  ;;  %2700 = vst [vmem:[#allocation28_spill] sm:$0xff] %v1409_v15  ;;  %v1411_v16 = vld [vmem:[#allocation2 + $0x30] sm:$0xff]  ;;  %v1413_v17 = vld [vmem:[#allocation2 + $0x38] sm:$0xff]  ;;  %v85_v20 = vsub.f32 %v1403_v12, %v1387_v4  ;;  %v86_v21 = vsub.f32 %v1409_v15, %v1389_v5  ;;  %v89_v24 = vand.u32 2147483647, %v81_v13 }
  0x3f   :  { %2701 = vst [vmem:[#allocation29_spill] sm:$0xff] %v1411_v16  ;;  %2702 = vst [vmem:[#allocation30_spill] sm:$0xff] %v1413_v17  ;;  %v87_v22 = vsub.f32 %v1411_v16, %v1391_v6  ;;  %v88_v23 = vsub.f32 %v1413_v17, %v1393_v7  ;;  %v90_v25 = vand.u32 2147483647, %v82_v14  ;;  %v91_v26 = vand.u32 2147483647, %v83_v18 }
  0x40   :  { %v92_v27 = vand.u32 2147483647, %v84_v19  ;;  %v93_v28 = vand.u32 2147483647, %v85_v20  ;;  %v94_v29 = vand.u32 2147483647, %v86_v21 }
  0x41   :  { %v95_v30 = vand.u32 2147483647, %v87_v22  ;;  %v96_v31 = vand.u32 2147483647, %v88_v23  ;;  %vm1427_vm0 = vcmp.lt.f32.partialorder %v89_v24, 1.0  ;;  %vm1431_vm1 = vcmp.lt.f32.partialorder %v90_v25, 1.0 }
  0x42   :  { %vm1435_vm2 = vcmp.lt.f32.partialorder %v91_v26, 1.0  ;;  %vm1439_vm3 = vcmp.lt.f32.partialorder %v92_v27, 1.0  ;;  %vm1443_vm4 = vcmp.lt.f32.partialorder %v93_v28, 1.0  ;;  %vm1447_vm5 = vcmp.lt.f32.partialorder %v94_v29, 1.0  ;;  %v1483_v32 = vld [vmem:[#allocation2 + $0x60] sm:$0xff]  ;;  %v1485_v33 = vld [vmem:[#allocation2 + $0x68] sm:$0xff] }
  0x43   :  { %vm1451_vm6 = vcmp.lt.f32.partialorder %v95_v30, 1.0  ;;  %vm1455_vm7 = vcmp.lt.f32.partialorder %v96_v31, 1.0  ;;  %v105_v40 = vmul.f32 0.5, %v81_v13  ;;  %v106_v41 = vmul.f32 0.5, %v82_v14  ;;  %2723 = vst [vmem:[#allocation35_spill] sm:$0xff] %v1483_v32  ;;  %2724 = vst [vmem:[#allocation36_spill] sm:$0xff] %v1485_v33 }
  0x44   :  { %v107_v42 = vmul.f32 0.5, %v83_v18  ;;  %v108_v43 = vmul.f32 0.5, %v84_v19  ;;  %v109_v44 = vmul.f32 0.5, %v85_v20  ;;  %v110_v45 = vmul.f32 0.5, %v86_v21  ;;  %v1487_v34 = vld [vmem:[#allocation2 + $0x70] sm:$0xff]  ;;  %v1489_v35 = vld [vmem:[#allocation2 + $0x78] sm:$0xff] }
  0x45   :  { %v111_v46 = vmul.f32 0.5, %v87_v22  ;;  %v112_v47 = vmul.f32 0.5, %v88_v23  ;;  %v113_v48 = vmul.f32 %v105_v40, %v81_v13  ;;  %v114_v49 = vmul.f32 %v106_v41, %v82_v14  ;;  %2725 = vst [vmem:[#allocation37_spill] sm:$0xff] %v1487_v34  ;;  %2726 = vst [vmem:[#allocation38_spill] sm:$0xff] %v1489_v35 }
  0x46   :  { %v115_v50 = vmul.f32 %v107_v42, %v83_v18  ;;  %v116_v51 = vmul.f32 %v108_v43, %v84_v19  ;;  %v117_v52 = vmul.f32 %v109_v44, %v85_v20  ;;  %v118_v53 = vmul.f32 %v110_v45, %v86_v21 }
  0x47   :  { %v119_v54 = vmul.f32 %v111_v46, %v87_v22  ;;  %v120_v55 = vmul.f32 %v112_v47, %v88_v23  ;;  %v1089_v56 = vadd.f32 -0.5, %v89_v24  ;;  %v1090_v57 = vadd.f32 -0.5, %v90_v25  ;;  %v1475_v25 = vld [vmem:[#allocation2 + $0x40] sm:$0xff] }
  0x48   :  { %v1091_v58 = vadd.f32 -0.5, %v91_v26  ;;  %v1092_v59 = vadd.f32 -0.5, %v92_v27  ;;  %v1093_v60 = vadd.f32 -0.5, %v93_v28  ;;  %v1094_v61 = vadd.f32 -0.5, %v94_v29  ;;  %2719 = vst [vmem:[#allocation31_spill] sm:$0xff] %v1475_v25  ;;  %v1477_v26 = vld [vmem:[#allocation2 + $0x48] sm:$0xff] }
  0x49   :  { %v1095_v62 = vadd.f32 -0.5, %v95_v30  ;;  %v1096_v63 = vadd.f32 -0.5, %v96_v31  ;;  %v129_v17 = vsel %vm1427_vm0, %v113_v48, %v1089_v56  ;;  %v130_v13 = vsel %vm1431_vm1, %v114_v49, %v1090_v57  ;;  %2720 = vst [vmem:[#allocation32_spill] sm:$0xff] %v1477_v26  ;;  %v1479_v27 = vld [vmem:[#allocation2 + $0x50] sm:$0xff]  ;;  %v1481_v29 = vld [vmem:[#allocation2 + $0x58] sm:$0xff] }
  0x4a   :  { %v131_v14 = vsel %vm1435_vm2, %v115_v50, %v1091_v58  ;;  %v133_v18 = vsel %vm1443_vm4, %v117_v52, %v1093_v60  ;;  %v134_v19 = vsel %vm1447_vm5, %v118_v53, %v1094_v61  ;;  %v132_v21 = vsel %vm1439_vm3, %v116_v51, %v1092_v59  ;;  %2721 = vst [vmem:[#allocation33_spill] sm:$0xff] %v1479_v27  ;;  %v1575_v60 = vld [vmem:[#allocation2 + $0xa0] sm:$0xff] }
  0x4b   :  { %v135_v20 = vsel %vm1451_vm6, %v119_v54, %v1095_v62  ;;  %v136_v22 = vsel %vm1455_vm7, %v120_v55, %v1096_v63  ;;  %v137_v23 = vadd.f32 %v133_v18, %v129_v17  ;;  %v144_v24 = vadd.f32 %v134_v19, %v130_v13  ;;  %2722 = vst [vmem:[#allocation34_spill] sm:$0xff] %v1481_v29  ;;  %v1577_v62 = vld [vmem:[#allocation2 + $0xa8] sm:$0xff] }
  0x4c   :  { %v151_v28 = vadd.f32 %v135_v20, %v131_v14  ;;  %v158_v31 = vadd.f32 %v136_v22, %v132_v21  ;;  %v178_v17 = vsub.f32 %v1475_v25, %v1379_v0  ;;  %v179_v36 = vsub.f32 %v1477_v26, %v1381_v1  ;;  %2747 = vst [vmem:[#allocation43_spill] sm:$0xff] %v1575_v60 }
  0x4d   :  { %v138_v30 = vrot.slane %v137_v23, 4  ;;  %v180_v37 = vsub.f32 %v1479_v27, %v1383_v2  ;;  %v145_v38 = vrot.slane %v144_v24, 4  ;;  %v181_v39 = vsub.f32 %v1481_v29, %v1385_v3  ;;  %2748 = vst [vmem:[#allocation44_spill] sm:$0xff] %v1577_v62 }
  0x4e   :  { %v152_v40 = vrot.slane %v151_v28, 4  ;;  %v182_v41 = vsub.f32 %v1483_v32, %v1387_v4  ;;  %v183_v42 = vsub.f32 %v1485_v33, %v1389_v5  ;;  %v184_v43 = vsub.f32 %v1487_v34, %v1391_v6 }
  0x4f   :  { %v1505_v44 = vadd.f32 %v138_v30, %v137_v23  ;;  %v159_v45 = vrot.slane %v158_v31, 4  ;;  %v185_v46 = vsub.f32 %v1489_v35, %v1393_v7  ;;  %v186_v47 = vand.u32 2147483647, %v178_v17 }
  0x50   :  { %v187_v48 = vand.u32 2147483647, %v179_v36  ;;  %v188_v49 = vand.u32 2147483647, %v180_v37  ;;  %v1509_v50 = vadd.f32 %v145_v38, %v144_v24  ;;  %v189_v51 = vand.u32 2147483647, %v181_v39 }
  0x51   :  { %v1511_v52 = vadd.f32 %v152_v40, %v151_v28  ;;  %v190_v53 = vand.u32 2147483647, %v182_v41  ;;  %v191_v54 = vand.u32 2147483647, %v183_v42  ;;  %v192_v55 = vand.u32 2147483647, %v184_v43 }
  0x52   :  { %v140_v56 = vrot.slane %v1505_v44, 2  ;;  %v160_v57 = vadd.f32 %v159_v45, %v158_v31  ;;  %v193_v58 = vand.u32 2147483647, %v185_v46  ;;  %v202_v59 = vmul.f32 0.5, %v178_v17 }
  0x53   :  { %vm1514_vm8 = vcmp.lt.f32.partialorder %v186_v47, 1.0  ;;  %vm1518_vm9 = vcmp.lt.f32.partialorder %v187_v48, 1.0  ;;  %vm1522_vm10 = vcmp.lt.f32.partialorder %v188_v49, 1.0  ;;  %v203_v63 = vmul.f32 0.5, %v179_v36 }
  0x54   :  { %vm1526_vm11 = vcmp.lt.f32.partialorder %v189_v51, 1.0  ;;  %v204_v14 = vmul.f32 0.5, %v180_v37  ;;  %v205_v18 = vmul.f32 0.5, %v181_v39  ;;  %v206_v19 = vmul.f32 0.5, %v182_v41 }
  0x55   :  { %vm1530_vm12 = vcmp.lt.f32.partialorder %v190_v53, 1.0  ;;  %vm1534_vm13 = vcmp.lt.f32.partialorder %v191_v54, 1.0  ;;  %vm1538_vm14 = vcmp.lt.f32.partialorder %v192_v55, 1.0  ;;  %v207_v23 = vmul.f32 0.5, %v183_v42 }
  0x56   :  { %vm1542_vm15 = vcmp.lt.f32.partialorder %v193_v58, 1.0  ;;  %v208_v28 = vmul.f32 0.5, %v184_v43  ;;  %v209_v30 = vmul.f32 0.5, %v185_v46  ;;  %v210_v31 = vmul.f32 %v202_v59, %v178_v17  ;;  %v1573_v59 = vld [vmem:[#allocation2 + $0x98] sm:$0xff] }
  0x57   :  { %v211_v38 = vmul.f32 %v203_v63, %v179_v36  ;;  %v212_v40 = vmul.f32 %v204_v14, %v180_v37  ;;  %v213_v45 = vmul.f32 %v205_v18, %v181_v39  ;;  %v214_v35 = vmul.f32 %v206_v19, %v182_v41  ;;  %2746 = vst [vmem:[#allocation42_spill] sm:$0xff] %v1573_v59  ;;  %v1579_v63 = vld [vmem:[#allocation2 + $0xb0] sm:$0xff]  ;;  %v1589_v14 = vld [vmem:[#allocation2 + $0xb8] sm:$0xff] }
  0x58   :  { %v215_v34 = vmul.f32 %v207_v23, %v183_v42  ;;  %v216_v16 = vmul.f32 %v208_v28, %v184_v43  ;;  %v217_v33 = vmul.f32 %v209_v30, %v185_v46  ;;  %v1097_v15 = vadd.f32 -0.5, %v186_v47  ;;  %2749 = vst [vmem:[#allocation45_spill] sm:$0xff] %v1579_v63  ;;  %2750 = vst [vmem:[#allocation46_spill] sm:$0xff] %v1589_v14 }
  0x59   :  { %v1098_v32 = vadd.f32 -0.5, %v187_v48  ;;  %v1099_v12 = vadd.f32 -0.5, %v188_v49  ;;  %v1100_v29 = vadd.f32 -0.5, %v189_v51  ;;  %v1101_v11 = vadd.f32 -0.5, %v190_v53 }
  0x5a   :  { %v1102_v27 = vadd.f32 -0.5, %v191_v54  ;;  %v1103_v10 = vadd.f32 -0.5, %v192_v55  ;;  %v1104_v26 = vadd.f32 -0.5, %v193_v58  ;;  %v226_v9 = vsel %vm1514_vm8, %v210_v31, %v1097_v15  ;;  %v1571_v58 = vld [vmem:[#allocation2 + $0x90] sm:$0xff] }
  0x5b   :  { %v227_v17 = vsel %vm1518_vm9, %v211_v38, %v1098_v32  ;;  %v228_v36 = vsel %vm1522_vm10, %v212_v40, %v1099_v12  ;;  %v229_v37 = vsel %vm1526_vm11, %v213_v45, %v1100_v29  ;;  %v230_v39 = vsel %vm1530_vm12, %v214_v35, %v1101_v11  ;;  %2745 = vst [vmem:[#allocation41_spill] sm:$0xff] %v1571_v58 }
  0x5c   :  { %v231_v41 = vsel %vm1534_vm13, %v215_v34, %v1102_v27  ;;  %v232_v42 = vsel %vm1538_vm14, %v216_v16, %v1103_v10  ;;  %v233_v15 = vsel %vm1542_vm15, %v217_v33, %v1104_v26  ;;  %v234_v43 = vadd.f32 %v230_v39, %v226_v9  ;;  %v1565_v26 = vld [vmem:[#allocation2 + $0x80] sm:$0xff]  ;;  %v1567_v9 = vld [vmem:[#allocation2 + $0x88] sm:$0xff] }
  0x5d   :  { %v241_v32 = vadd.f32 %v231_v41, %v227_v17  ;;  %v248_v46 = vadd.f32 %v232_v42, %v228_v36  ;;  %v255_v47 = vadd.f32 %v233_v15, %v229_v37  ;;  %v147_v12 = vrot.slane %v1509_v50, 2  ;;  %2743 = vst [vmem:[#allocation39_spill] sm:$0xff] %v1565_v26  ;;  %2744 = vst [vmem:[#allocation40_spill] sm:$0xff] %v1567_v9 }
  0x5e   :  { %v154_v29 = vrot.slane %v1511_v52, 2  ;;  %v161_v48 = vrot.slane %v160_v57, 2  ;;  %v235_v49 = vrot.slane %v234_v43, 4  ;;  %v141_v11 = vadd.f32 %v140_v56, %v1505_v44 }
  0x5f   :  { %v242_v35 = vrot.slane %v241_v32, 4  ;;  %v249_v27 = vrot.slane %v248_v46, 4  ;;  %v256_v34 = vrot.slane %v255_v47, 4  ;;  %v148_v33 = vadd.f32 %v147_v12, %v1509_v50 }
  0x60   :  { %v236_v51 = vadd.f32 %v235_v49, %v234_v43  ;;  %v155_v54 = vadd.f32 %v154_v29, %v1511_v52  ;;  %v162_v55 = vadd.f32 %v161_v48, %v160_v57  ;;  %v142_v44 = vrot.slane %v141_v11, 1 }
  0x61   :  { %v243_v10 = vadd.f32 %v242_v35, %v241_v32  ;;  %v250_v16 = vadd.f32 %v249_v27, %v248_v46  ;;  %v257_v53 = vadd.f32 %v256_v34, %v255_v47  ;;  %v1583_v13 = vsub.f32 %v1565_v26, %v1379_v0 }
  0x62   :  { %v237_v56 = vrot.slane %v236_v51, 2  ;;  %v1587_v50 = vsub.f32 %v1567_v9, %v1381_v1  ;;  %v317_v18 = vsub.f32 %v1571_v58, %v1383_v2  ;;  %v318_v19 = vsub.f32 %v1573_v59, %v1385_v3 }
  0x63   :  { %v244_v61 = vrot.slane %v243_v10, 2  ;;  %v251_v52 = vrot.slane %v250_v16, 2  ;;  %v258_v57 = vrot.slane %v257_v53, 2  ;;  %v149_v20 = vrot.slane %v148_v33, 1 }
  0x64   :  { %v156_v21 = vrot.slane %v155_v54, 1  ;;  %v163_v22 = vrot.slane %v162_v55, 1  ;;  %v319_v23 = vsub.f32 %v1575_v60, %v1387_v4  ;;  %v1597_v24 = vadd.f32 %v142_v44, %v141_v11  ;;  %v1678_v11 = vld [vmem:[#allocation2 + $0xc0] sm:$0xff] }
  0x65   :  { %v238_v28 = vadd.f32 %v237_v56, %v236_v51  ;;  %v320_v30 = vsub.f32 %v1577_v62, %v1389_v5  ;;  %v321_v31 = vsub.f32 %v1579_v63, %v1391_v6  ;;  %v245_v38 = vadd.f32 %v244_v61, %v243_v10  ;;  %2776 = vst [vmem:[#allocation56_spill] sm:$0xff] %v1678_v11 }
  0x66   :  { %v322_v40 = vsub.f32 %v1589_v14, %v1393_v7  ;;  %v323_v45 = vand.u32 2147483647, %v1583_v13  ;;  %v324_v17 = vand.u32 2147483647, %v1587_v50  ;;  %v252_v36 = vadd.f32 %v251_v52, %v250_v16 }
  0x67   :  { %v259_v37 = vadd.f32 %v258_v57, %v257_v53  ;;  %v325_v39 = vand.u32 2147483647, %v317_v18  ;;  %v326_v41 = vand.u32 2147483647, %v318_v19  ;;  %v150_v42 = vadd.f32 %v149_v20, %v148_v33  ;;  %v1702_v57 = vld [vmem:[#allocation2 + $0xf0] sm:$0xff]  ;;  %v1704_v20 = vld [vmem:[#allocation2 + $0xf8] sm:$0xff] }
  0x68   :  { %v157_v15 = vadd.f32 %v156_v21, %v155_v54  ;;  %v164_v43 = vadd.f32 %v163_v22, %v162_v55  ;;  %v327_v32 = vand.u32 2147483647, %v319_v23  ;;  %v239_v46 = vrot.slane %v238_v28, 1  ;;  %2783 = vst [vmem:[#allocation63_spill] sm:$0xff] %v1702_v57  ;;  %2784 = vst [vmem:[#allocation64_spill] sm:$0xff] %v1704_v20 }
  0x69   :  { %v328_v47 = vand.u32 2147483647, %v320_v30  ;;  %v329_v12 = vand.u32 2147483647, %v321_v31  ;;  %v339_v29 = vmul.f32 0.5, %v1583_v13  ;;  %v246_v48 = vrot.slane %v245_v38, 1 }
  0x6a   :  { %v330_v49 = vand.u32 2147483647, %v322_v40  ;;  %vm1608_vm0 = vcmp.lt.f32.partialorder %v323_v45, 1.0  ;;  %vm1612_vm1 = vcmp.lt.f32.partialorder %v324_v17, 1.0  ;;  %v253_v27 = vrot.slane %v252_v36, 1 }
  0x6b   :  { %v260_v34 = vrot.slane %v259_v37, 1  ;;  %vm1616_vm2 = vcmp.lt.f32.partialorder %v325_v39, 1.0  ;;  %vm1620_vm3 = vcmp.lt.f32.partialorder %v326_v41, 1.0  ;;  %v340_v16 = vmul.f32 0.5, %v1587_v50 }
  0x6c   :  { %v341_v53 = vmul.f32 0.5, %v317_v18  ;;  %v342_v33 = vmul.f32 0.5, %v318_v19  ;;  %v343_v54 = vmul.f32 0.5, %v319_v23  ;;  %v240_v55 = vadd.f32 %v239_v46, %v238_v28 }
  0x6d   :  { %v344_v44 = vmul.f32 0.5, %v320_v30  ;;  %v345_v56 = vmul.f32 0.5, %v321_v31  ;;  %v346_v61 = vmul.f32 0.5, %v322_v40  ;;  %v247_v52 = vadd.f32 %v246_v48, %v245_v38 }
  0x6e   :  { %vm1625_vm4 = vcmp.lt.f32.partialorder %v327_v32, 1.0  ;;  %vm1629_vm5 = vcmp.lt.f32.partialorder %v328_v47, 1.0  ;;  %vm1633_vm6 = vcmp.lt.f32.partialorder %v329_v12, 1.0  ;;  %v254_v22 = vadd.f32 %v253_v27, %v252_v36 }
  0x6f   :  { %v261_v14 = vadd.f32 %v260_v34, %v259_v37  ;;  %vm1637_vm7 = vcmp.lt.f32.partialorder %v330_v49, 1.0  ;;  %v347_v38 = vmul.f32 %v339_v29, %v1583_v13  ;;  %v348_v46 = vmul.f32 %v340_v16, %v1587_v50 }
  0x70   :  { %v349_v48 = vmul.f32 %v341_v53, %v317_v18  ;;  %v350_v63 = vmul.f32 %v342_v33, %v318_v19  ;;  %v351_v62 = vmul.f32 %v343_v54, %v319_v23  ;;  %vm854_vm8 = vcmask 1045504   ;;  %v1686_v53 = vld [vmem:[#allocation2 + $0xc8] sm:$0xff]  ;;  %v1690_v33 = vld [vmem:[#allocation2 + $0xd8] sm:$0xff] }
  0x71   :  { %v352_v60 = vmul.f32 %v344_v44, %v320_v30  ;;  %v353_v59 = vmul.f32 %v345_v56, %v321_v31  ;;  %v354_v58 = vmul.f32 %v346_v61, %v322_v40  ;;  %v1105_v9 = vadd.f32 -0.5, %v323_v45  ;;  %2778 = vst [vmem:[#allocation58_spill] sm:$0xff] %v1686_v53  ;;  %2780 = vst [vmem:[#allocation60_spill] sm:$0xff] %v1690_v33 }
  0x72   :  { %v1106_v26 = vadd.f32 -0.5, %v324_v17  ;;  %v1107_v25 = vadd.f32 -0.5, %v325_v39  ;;  %v1108_v36 = vadd.f32 -0.5, %v326_v41  ;;  %v1109_v37 = vadd.f32 -0.5, %v327_v32  ;;  %v1668_v41 = vld [vmem:[#allocation7] sm:$0x3f] }
  0x73   :  { %v1110_v27 = vadd.f32 -0.5, %v328_v47  ;;  %v1111_v34 = vadd.f32 -0.5, %v329_v12  ;;  %v1112_v8 = vadd.f32 -0.5, %v330_v49  ;;  %v363_v13 = vsel %vm1608_vm0, %v347_v38, %v1105_v9  ;;  %2771 = vst [vmem:[#allocation51_spill] sm:$0xff] %v1668_v41 }
  0x74   :  { %v364_v50 = vsel %vm1612_vm1, %v348_v46, %v1106_v26  ;;  %v365_v18 = vsel %vm1616_vm2, %v349_v48, %v1107_v25  ;;  %v366_v19 = vsel %vm1620_vm3, %v350_v63, %v1108_v36  ;;  %v367_v23 = vsel %vm1625_vm4, %v351_v62, %v1109_v37 }
  0x75   :  { %v368_v30 = vsel %vm1629_vm5, %v352_v60, %v1110_v27  ;;  %v369_v31 = vsel %vm1633_vm6, %v353_v59, %v1111_v34  ;;  %v370_v9 = vsel %vm1637_vm7, %v354_v58, %v1112_v8  ;;  %v371_v40 = vadd.f32 %v367_v23, %v363_v13 }
  0x76   :  { %v1660_v26 = vmul.f32 0.0625, %v1597_v24  ;;  %v378_v25 = vadd.f32 %v368_v30, %v364_v50  ;;  %v385_v45 = vadd.f32 %v369_v31, %v365_v18  ;;  %v392_v17 = vadd.f32 %v370_v9, %v366_v19  ;;  %v2789_v9 = vld [vmem:[#allocation23_spill] sm:$0xff] }
  0x77   :  { %v1662_v63 = vmul.f32 0.0625, %v150_v42  ;;  %v1664_v39 = vmul.f32 0.0625, %v157_v15  ;;  %v1666_v62 = vmul.f32 0.0625, %v164_v43  ;;  %v372_v60 = vrot.slane %v371_v40, 4 }
  0x78   :  { %2767 = vst [vmem:[#allocation47_spill] sm:$0xff] %v1660_v26  ;;  %v1670_v59 = vmul.f32 0.0625, %v240_v55  ;;  %v379_v32 = vrot.slane %v378_v25, 4  ;;  %v386_v8 = vrot.slane %v385_v45, 4  ;;  %v393_v58 = vrot.slane %v392_v17, 4  ;;  %v1698_v55 = vld [vmem:[#allocation2 + $0xe0] sm:$0xff] }
  0x79   :  { %2768 = vst [vmem:[#allocation48_spill] sm:$0xff] %v1662_v63  ;;  %2769 = vst [vmem:[#allocation49_spill] sm:$0xff] %v1664_v39  ;;  %v1672_v47 = vmul.f32 0.0625, %v247_v52  ;;  %v1674_v24 = vmul.f32 0.0625, %v254_v22  ;;  %v1676_v12 = vmul.f32 0.0625, %v261_v14  ;;  %v373_v42 = vadd.f32 %v372_v60, %v371_v40  ;;  %v1688_v14 = vld [vmem:[#allocation2 + $0xd0] sm:$0xff] }
  0x7a   :  { %2770 = vst [vmem:[#allocation50_spill] sm:$0xff] %v1666_v62  ;;  %2772 = vst [vmem:[#allocation52_spill] sm:$0xff] %v1670_v59  ;;  %v380_v29 = vadd.f32 %v379_v32, %v378_v25  ;;  %v387_v15 = vadd.f32 %v386_v8, %v385_v45  ;;  %v394_v49 = vadd.f32 %v393_v58, %v392_v17  ;;  %v1682_v35 = vsel %vm854_vm8, %v1668_v41, -inf  ;;  %v1700_v52 = vld [vmem:[#allocation2 + $0xe8] sm:$0xff]  ;;  %v2792_v32 = vld [vmem:[#allocation24_spill] sm:$0xff] }
  0x7b   :  { %2773 = vst [vmem:[#allocation53_spill] sm:$0xff] %v1672_v47  ;;  %2774 = vst [vmem:[#allocation54_spill] sm:$0xff] %v1674_v24  ;;  %v374_v43 = vrot.slane %v373_v42, 2  ;;  %vm266_vm9 = vcmp.lt.f32.partialorder %v1670_v59, %v1660_v26  ;;  %vm267_vm10 = vcmp.lt.f32.partialorder %v1672_v47, %v1662_v63  ;;  %vm268_vm11 = vcmp.lt.f32.partialorder %v1674_v24, %v1664_v39  ;;  %v2790_v40 = vld [vmem:[#allocation31_spill] sm:$0xff]  ;;  %v2793_v8 = vld [vmem:[#allocation32_spill] sm:$0xff] }
  0x7c   :  { %2775 = vst [vmem:[#allocation55_spill] sm:$0xff] %v1676_v12  ;;  %2777 = vst [vmem:[#allocation57_spill] sm:$0xff] %v1682_v35  ;;  %v381_v51 = vrot.slane %v380_v29, 2  ;;  %v388_v10 = vrot.slane %v387_v15, 2  ;;  %v395_v16 = vrot.slane %v394_v49, 2  ;;  %vm2643_vm12 = vcmp.lt.f32.partialorder %v1676_v12, %v1666_v62 }
  0x7d   :  { %2779 = vst [vmem:[#allocation59_spill] sm:$0xff] %v1688_v14  ;;  %v375_v54 = vadd.f32 %v374_v43, %v373_v42  ;;  %2781 = vst [vmem:[#allocation61_spill] sm:$0xff] %v1698_v55  ;;  %v452_v21 = vsub.f32 %v1678_v11, %v1379_v0  ;;  %v1713_v22 = vsel %vm266_vm9, %v1670_v59, %v1660_v26  ;;  %v2795_v42 = vld [vmem:[#allocation25_spill] sm:$0xff]  ;;  %v2799_v43 = vld [vmem:[#allocation34_spill] sm:$0xff] }
  0x7e   :  { %v382_v44 = vadd.f32 %v381_v51, %v380_v29  ;;  %v389_v56 = vadd.f32 %v388_v10, %v387_v15  ;;  %v396_v61 = vadd.f32 %v395_v16, %v394_v49  ;;  %2782 = vst [vmem:[#allocation62_spill] sm:$0xff] %v1700_v52  ;;  %2785 = vst [vmem:[#allocation65_spill] sm:$0xff] %v1713_v22  ;;  %v2796_v29 = vld [vmem:[#allocation33_spill] sm:$0xff]  ;;  %v2798_v49 = vld [vmem:[#allocation26_spill] sm:$0xff] }
  0x7f   :  { %v453_v28 = vsub.f32 %v1686_v53, %v1381_v1  ;;  %v454_v38 = vsub.f32 %v1688_v14, %v1383_v2  ;;  %v455_v46 = vsub.f32 %v1690_v33, %v1385_v3  ;;  %v1726_v48 = vsel %vm267_vm10, %v1672_v47, %v1662_v63 }
  0x80   :  { %2786 = vst [vmem:[#allocation66_spill] sm:$0xff] %v1726_v48  ;;  %v1733_v36 = vsel %vm268_vm11, %v1674_v24, %v1664_v39  ;;  %v1740_v37 = vsel %vm2643_vm12, %v1676_v12, %v1666_v62  ;;  %v456_v27 = vsub.f32 %v1698_v55, %v1387_v4  ;;  %v376_v34 = vrot.slane %v375_v54, 1 }
  0x81   :  { %2787 = vst [vmem:[#allocation67_spill] sm:$0xff] %v1733_v36  ;;  %2788 = vst [vmem:[#allocation68_spill] sm:$0xff] %v1740_v37  ;;  %v457_v13 = vsub.f32 %v1700_v52, %v1389_v5  ;;  %v458_v50 = vsub.f32 %v1702_v57, %v1391_v6  ;;  %v459_v18 = vsub.f32 %v1704_v20, %v1393_v7  ;;  %v383_v19 = vrot.slane %v382_v44, 1 }
  0x82   :  { %v390_v23 = vrot.slane %v389_v56, 1  ;;  %v397_v30 = vrot.slane %v396_v61, 1  ;;  %v460_v31 = vand.u32 2147483647, %v452_v21  ;;  %v1755_v25 = vsel %vm266_vm9, %v2790_v40, %v2789_v9 }
  0x83   :  { %2791 = vst [vmem:[#allocation23_spill] sm:$0xff] %v1755_v25  ;;  %v461_v45 = vand.u32 2147483647, %v453_v28  ;;  %v462_v17 = vand.u32 2147483647, %v454_v38  ;;  %v1762_v58 = vsel %vm267_vm10, %v2793_v8, %v2792_v32  ;;  %v1769_v15 = vsel %vm268_vm11, %v2796_v29, %v2795_v42 }
  0x84   :  { %v463_v60 = vand.u32 2147483647, %v455_v46  ;;  %2794 = vst [vmem:[#allocation31_spill] sm:$0xff] %v1762_v58  ;;  %2797 = vst [vmem:[#allocation24_spill] sm:$0xff] %v1769_v15  ;;  %v1776_v51 = vsel %vm2643_vm12, %v2799_v43, %v2798_v49  ;;  %v464_v10 = vand.u32 2147483647, %v456_v27  ;;  %v377_v16 = vadd.f32 %v376_v34, %v375_v54 }
  0x85   :  { %2800 = vst [vmem:[#allocation32_spill] sm:$0xff] %v1776_v51  ;;  %v465_v9 = vand.u32 2147483647, %v457_v13  ;;  %v466_v40 = vand.u32 2147483647, %v458_v50  ;;  %v384_v8 = vadd.f32 %v383_v19, %v382_v44  ;;  %v391_v41 = vadd.f32 %v390_v23, %v389_v56  ;;  %v1892_v44 = vld [vmem:[#allocation2 + $0x108] sm:$0xff] }
  0x86   :  { %v467_v32 = vand.u32 2147483647, %v459_v18  ;;  %v398_v35 = vadd.f32 %v397_v30, %v396_v61  ;;  %vm1778_vm13 = vcmp.lt.f32.partialorder %v460_v31, 1.0  ;;  %vm1782_vm14 = vcmp.lt.f32.partialorder %v461_v45, 1.0 }
  0x87   :  { %vm1786_vm15 = vcmp.lt.f32.partialorder %v462_v17, 1.0  ;;  %vm1790_vm0 = vcmp.lt.f32.partialorder %v463_v60, 1.0  ;;  %v476_v34 = vmul.f32 0.5, %v452_v21  ;;  %vm1794_vm1 = vcmp.lt.f32.partialorder %v464_v10, 1.0 }
  0x88   :  { %v477_v56 = vmul.f32 0.5, %v453_v28  ;;  %v478_v61 = vmul.f32 0.5, %v454_v38  ;;  %v479_v19 = vmul.f32 0.5, %v455_v46  ;;  %v1798_v23 = vmul.f32 0.0625, %v377_v16 }
  0x89   :  { %vm1800_vm2 = vcmp.lt.f32.partialorder %v465_v9, 1.0  ;;  %vm1804_vm3 = vcmp.lt.f32.partialorder %v466_v40, 1.0  ;;  %vm1808_vm4 = vcmp.lt.f32.partialorder %v467_v32, 1.0  ;;  %v1812_v57 = vmul.f32 0.0625, %v384_v8 }
  0x8a   :  { %2811 = vst [vmem:[#allocation25_spill] sm:$0xff] %v1798_v23  ;;  %v1814_v52 = vmul.f32 0.0625, %v391_v41  ;;  %v1816_v55 = vmul.f32 0.0625, %v398_v35  ;;  %v480_v16 = vmul.f32 0.5, %v456_v27  ;;  %v481_v33 = vmul.f32 0.5, %v457_v13 }
  0x8b   :  { %2818 = vst [vmem:[#allocation33_spill] sm:$0xff] %v1812_v57  ;;  %v482_v14 = vmul.f32 0.5, %v458_v50  ;;  %v483_v53 = vmul.f32 0.5, %v459_v18  ;;  %v484_v11 = vmul.f32 %v476_v34, %v452_v21  ;;  %v485_v7 = vmul.f32 %v477_v56, %v453_v28  ;;  %v2836_v56 = vld [vmem:[#allocation23_spill] sm:$0xff] }
  0x8c   :  { %2819 = vst [vmem:[#allocation26_spill] sm:$0xff] %v1814_v52  ;;  %2820 = vst [vmem:[#allocation34_spill] sm:$0xff] %v1816_v55  ;;  %v486_v6 = vmul.f32 %v478_v61, %v454_v38  ;;  %v487_v51 = vmul.f32 %v479_v19, %v455_v46  ;;  %v488_v5 = vmul.f32 %v480_v16, %v456_v27  ;;  %v1113_v1 = vadd.f32 -0.5, %v460_v31  ;;  %v2826_v31 = vld [vmem:[#allocation37_spill] sm:$0xff]  ;;  %v2837_v61 = vld [vmem:[#allocation39_spill] sm:$0xff] }
  0x8d   :  { %v489_v4 = vmul.f32 %v481_v33, %v457_v13  ;;  %v490_v3 = vmul.f32 %v482_v14, %v458_v50  ;;  %v491_v2 = vmul.f32 %v483_v53, %v459_v18  ;;  %v1114_v0 = vadd.f32 -0.5, %v461_v45  ;;  %v2824_v13 = vld [vmem:[#allocation36_spill] sm:$0xff]  ;;  %v2825_v18 = vld [vmem:[#allocation29_spill] sm:$0xff]  ;;  %v2827_v45 = vld [vmem:[#allocation30_spill] sm:$0xff]  ;;  %2835 = vst [vmem:[#allocation37_spill] sm:$0xff] %v1892_v44 }
  0x8e   :  { %v1115_v8 = vadd.f32 -0.5, %v462_v17  ;;  %v1116_v15 = vadd.f32 -0.5, %v463_v60  ;;  %v1117_v41 = vadd.f32 -0.5, %v464_v10  ;;  %v1118_v58 = vadd.f32 -0.5, %v465_v9  ;;  %v2828_v17 = vld [vmem:[#allocation38_spill] sm:$0xff]  ;;  %v1901_v16 = vld [vmem:[#allocation2 + $0x110] sm:$0xff] }
  0x8f   :  { %v1119_v35 = vadd.f32 -0.5, %v466_v40  ;;  %v1120_v25 = vadd.f32 -0.5, %v467_v32  ;;  %v500_v62 = vsel %vm1778_vm13, %v484_v11, %v1113_v1  ;;  %v501_v21 = vsel %vm1782_vm14, %v485_v7, %v1114_v0  ;;  %v2821_v0 = vld [vmem:[#allocation27_spill] sm:$0xff]  ;;  %v1869_v32 = vld [vmem:[#allocation2 + $0x100] sm:$0xff]  ;;  %2838 = vst [vmem:[#allocation30_spill] sm:$0xff] %v1901_v16 }
  0x90   :  { %v502_v28 = vsel %vm1786_vm15, %v486_v6, %v1115_v8  ;;  %v503_v53 = vsel %vm1790_vm0, %v487_v51, %v1116_v15  ;;  %v504_v14 = vsel %vm1794_vm1, %v488_v5, %v1117_v41  ;;  %v505_v33 = vsel %vm1800_vm2, %v489_v4, %v1118_v58  ;;  %v2822_v7 = vld [vmem:[#allocation35_spill] sm:$0xff]  ;;  %v1903_v8 = vld [vmem:[#allocation2 + $0x118] sm:$0xff]  ;;  %v1905_v41 = vld [vmem:[#allocation2 + $0x120] sm:$0xff] }
  0x91   :  { %v506_v38 = vsel %vm1804_vm3, %v490_v3, %v1119_v35  ;;  %v507_v1 = vsel %vm1808_vm4, %v491_v2, %v1120_v25  ;;  %v508_v11 = vadd.f32 %v504_v14, %v500_v62  ;;  %v302_v6 = vsel %vm266_vm9, %v2822_v7, %v2821_v0  ;;  %v2823_v62 = vld [vmem:[#allocation28_spill] sm:$0xff]  ;;  %2831 = vst [vmem:[#allocation35_spill] sm:$0xff] %v1869_v32  ;;  %v2841_v35 = vld [vmem:[#allocation31_spill] sm:$0xff]  ;;  %v2844_v14 = vld [vmem:[#allocation41_spill] sm:$0xff] }
  0x92   :  { %v515_v20 = vadd.f32 %v505_v33, %v501_v21  ;;  %v522_v46 = vadd.f32 %v506_v38, %v502_v28  ;;  %v529_v27 = vadd.f32 %v507_v1, %v503_v53  ;;  %vm2642_vm5 = vcmp.lt.f32.partialorder %v1798_v23, %v1713_v22  ;;  %2839 = vst [vmem:[#allocation38_spill] sm:$0xff] %v1903_v8  ;;  %v2842_v21 = vld [vmem:[#allocation40_spill] sm:$0xff]  ;;  %v1921_v1 = vld [vmem:[#allocation2 + $0x128] sm:$0xff] }
  0x93   :  { %vm2641_vm6 = vcmp.lt.f32.partialorder %v1812_v57, %v1726_v48  ;;  %vm2639_vm7 = vcmp.lt.f32.partialorder %v1814_v52, %v1733_v36  ;;  %v509_v2 = vrot.slane %v508_v11, 4  ;;  %vm2637_vm13 = vcmp.lt.f32.partialorder %v1816_v55, %v1740_v37  ;;  %2840 = vst [vmem:[#allocation23_spill] sm:$0xff] %v1905_v41  ;;  %v2843_v53 = vld [vmem:[#allocation24_spill] sm:$0xff]  ;;  %2845 = vst [vmem:[#allocation39_spill] sm:$0xff] %v1921_v1 }
  0x94   :  { %v516_v3 = vrot.slane %v515_v20, 4  ;;  %v523_v4 = vrot.slane %v522_v46, 4  ;;  %v530_v5 = vrot.slane %v529_v27, 4  ;;  %v303_v50 = vsel %vm267_vm10, %v2824_v13, %v2823_v62  ;;  %v2850_v62 = vld [vmem:[#allocation17_spill] sm:$0xff] }
  0x95   :  { %v304_v25 = vsel %vm268_vm11, %v2826_v31, %v2825_v18  ;;  %v305_v58 = vsel %vm2643_vm12, %v2828_v17, %v2827_v45  ;;  %v510_v15 = vadd.f32 %v509_v2, %v508_v11  ;;  %v1867_v51 = vsel %vm2642_vm5, %v1798_v23, %v1713_v22  ;;  %v2846_v11 = vld [vmem:[#allocation15_spill] sm:$0xff]  ;;  %v1929_v2 = vld [vmem:[#allocation2 + $0x138] sm:$0xff]  ;;  %v2851_v18 = vld [vmem:[#allocation18_spill] sm:$0xff] }
  0x96   :  { %2830 = vst [vmem:[#allocation27_spill] sm:$0xff] %v1867_v51  ;;  %v517_v10 = vadd.f32 %v516_v3, %v515_v20  ;;  %v524_v9 = vadd.f32 %v523_v4, %v522_v46  ;;  %v531_v40 = vadd.f32 %v530_v5, %v529_v27  ;;  %v1876_v42 = vsel %vm2641_vm6, %v1812_v57, %v1726_v48  ;;  %v1927_v27 = vld [vmem:[#allocation2 + $0x130] sm:$0xff]  ;;  %v2852_v45 = vld [vmem:[#allocation19_spill] sm:$0xff] }
  0x97   :  { %2832 = vst [vmem:[#allocation28_spill] sm:$0xff] %v1876_v42  ;;  %v1883_v29 = vsel %vm2639_vm7, %v1814_v52, %v1733_v36  ;;  %v1890_v54 = vsel %vm2637_vm13, %v1816_v55, %v1740_v37  ;;  %v511_v34 = vrot.slane %v510_v15, 2  ;;  %v1899_v19 = vsel %vm2642_vm5, %v2837_v61, %v2836_v56  ;;  %2847 = vst [vmem:[#allocation31_spill] sm:$0xff] %v1927_v27  ;;  %v2849_v3 = vld [vmem:[#allocation16_spill] sm:$0xff]  ;;  %v2855_v61 = vld [vmem:[#allocation42_spill] sm:$0xff] }
  0x98   :  { %2833 = vst [vmem:[#allocation36_spill] sm:$0xff] %v1883_v29  ;;  %2834 = vst [vmem:[#allocation29_spill] sm:$0xff] %v1890_v54  ;;  %v518_v30 = vrot.slane %v517_v10, 2  ;;  %v525_v49 = vrot.slane %v524_v9, 2  ;;  %v532_v43 = vrot.slane %v531_v40, 2  ;;  %v1912_v28 = vsel %vm2641_vm6, %v2842_v21, %v2841_v35  ;;  %v2854_v56 = vld [vmem:[#allocation32_spill] sm:$0xff] }
  0x99   :  { %v1919_v33 = vsel %vm2639_vm7, %v2844_v14, %v2843_v53  ;;  %v512_v38 = vadd.f32 %v511_v34, %v510_v15  ;;  %v1925_v0 = vsub.f32 %v1869_v32, %v2846_v11  ;;  %2848 = vst [vmem:[#allocation40_spill] sm:$0xff] %v1929_v2  ;;  %v590_v4 = vsub.f32 %v1892_v44, %v2849_v3  ;;  %v2857_v21 = vld [vmem:[#allocation22_spill] sm:$0xff]  ;;  %v2883_v52 = vld [vmem:[#allocation56_spill] sm:$0xff] }
  0x9a   :  { %v519_v7 = vadd.f32 %v518_v30, %v517_v10  ;;  %v526_v20 = vadd.f32 %v525_v49, %v524_v9  ;;  %v533_v46 = vadd.f32 %v532_v43, %v531_v40  ;;  %v591_v13 = vsub.f32 %v1901_v16, %v2850_v62  ;;  %v2853_v40 = vld [vmem:[#allocation20_spill] sm:$0xff]  ;;  %v2856_v43 = vld [vmem:[#allocation21_spill] sm:$0xff] }
  0x9b   :  { %v513_v5 = vrot.slane %v512_v38, 1  ;;  %v592_v31 = vsub.f32 %v1903_v8, %v2851_v18  ;;  %v593_v17 = vsub.f32 %v1905_v41, %v2852_v45  ;;  %v594_v34 = vsub.f32 %v1921_v1, %v2853_v40  ;;  %v2858_v18 = vld [vmem:[#allocation43_spill] sm:$0xff] }
  0x9c   :  { %v520_v15 = vrot.slane %v519_v7, 1  ;;  %v527_v10 = vrot.slane %v526_v20, 1  ;;  %v534_v9 = vrot.slane %v533_v46, 1  ;;  %v1946_v30 = vsel %vm2637_vm13, %v2855_v61, %v2854_v56 }
  0x9d   :  { %v514_v49 = vadd.f32 %v513_v5, %v512_v38  ;;  %v595_v35 = vsub.f32 %v1927_v27, %v2856_v43  ;;  %v596_v53 = vsub.f32 %v1929_v2, %v2857_v21  ;;  %v597_v62 = vand.u32 2147483647, %v1925_v0  ;;  %v2859_v5 = vld [vmem:[#allocation44_spill] sm:$0xff] }
  0x9e   :  { %v521_v14 = vadd.f32 %v520_v15, %v519_v7  ;;  %v528_v11 = vadd.f32 %v527_v10, %v526_v20  ;;  %v535_v3 = vadd.f32 %v534_v9, %v533_v46  ;;  %v1957_v45 = vsel %vm2642_vm5, %v2858_v18, %v302_v6  ;;  %v2860_v7 = vld [vmem:[#allocation45_spill] sm:$0xff]  ;;  %v2861_v10 = vld [vmem:[#allocation46_spill] sm:$0xff] }
  0x9f   :  { %v598_v40 = vand.u32 2147483647, %v590_v4  ;;  %v599_v56 = vand.u32 2147483647, %v591_v13  ;;  %v600_v38 = vand.u32 2147483647, %v592_v31  ;;  %v1963_v61 = vsel %vm2641_vm6, %v2859_v5, %v303_v50 }
  0xa0   :  { %v1969_v20 = vsel %vm2639_vm7, %v2860_v7, %v304_v25  ;;  %v601_v46 = vand.u32 2147483647, %v593_v17  ;;  %v602_v15 = vand.u32 2147483647, %v594_v34  ;;  %v1975_v6 = vsel %vm2637_vm13, %v2861_v10, %v305_v58  ;;  %v2896_v25 = vld [vmem:[#allocation64_spill] sm:$0xff] }
  0xa1   :  { %2862 = vst [vmem:[#allocation24_spill] sm:$0xff] %v1975_v6  ;;  %v1977_v9 = vmul.f32 0.0625, %v514_v49  ;;  %v603_v43 = vand.u32 2147483647, %v595_v35  ;;  %v604_v21 = vand.u32 2147483647, %v596_v53 }
  0xa2   :  { %v1979_v50 = vmul.f32 0.0625, %v521_v14  ;;  %v1981_v18 = vmul.f32 0.0625, %v528_v11  ;;  %v1983_v5 = vmul.f32 0.0625, %v535_v3  ;;  %vm1985_vm14 = vcmp.lt.f32.partialorder %v597_v62, 1.0 }
  0xa3   :  { %2863 = vst [vmem:[#allocation41_spill] sm:$0xff] %v1977_v9  ;;  %vm1989_vm15 = vcmp.lt.f32.partialorder %v598_v40, 1.0  ;;  %vm1993_vm0 = vcmp.lt.f32.partialorder %v599_v56, 1.0  ;;  %vm1997_vm1 = vcmp.lt.f32.partialorder %v600_v38, 1.0  ;;  %v613_v14 = vmul.f32 0.5, %v1925_v0 }
  0xa4   :  { %2864 = vst [vmem:[#allocation15_spill] sm:$0xff] %v1979_v50  ;;  %2865 = vst [vmem:[#allocation16_spill] sm:$0xff] %v1981_v18  ;;  %vm2002_vm2 = vcmp.lt.f32.partialorder %v601_v46, 1.0  ;;  %v614_v3 = vmul.f32 0.5, %v590_v4  ;;  %v615_v10 = vmul.f32 0.5, %v591_v13  ;;  %v616_v37 = vmul.f32 0.5, %v592_v31 }
  0xa5   :  { %2866 = vst [vmem:[#allocation17_spill] sm:$0xff] %v1983_v5  ;;  %vm2666_vm3 = vcmp.lt.f32.partialorder %v1977_v9, %v1867_v51  ;;  %vm2008_vm4 = vcmp.lt.f32.partialorder %v602_v15, 1.0  ;;  %vm2012_vm13 = vcmp.lt.f32.partialorder %v603_v43, 1.0  ;;  %vm2016_vm7 = vcmp.lt.f32.partialorder %v604_v21, 1.0 }
  0xa6   :  { %vm2665_vm6 = vcmp.lt.f32.partialorder %v1979_v50, %v1876_v42  ;;  %vm2664_vm5 = vcmp.lt.f32.partialorder %v1981_v18, %v1883_v29  ;;  %vm2663_vm12 = vcmp.lt.f32.partialorder %v1983_v5, %v1890_v54  ;;  %v617_v48 = vmul.f32 0.5, %v593_v17 }
  0xa7   :  { %v618_v57 = vmul.f32 0.5, %v594_v34  ;;  %v619_v22 = vmul.f32 0.5, %v595_v35  ;;  %v620_v23 = vmul.f32 0.5, %v596_v53  ;;  %v621_v60 = vmul.f32 %v613_v14, %v1925_v0  ;;  %v2140_v14 = vld [vmem:[#allocation2 + $0x168] sm:$0xff] }
  0xa8   :  { %v622_v12 = vmul.f32 %v614_v3, %v590_v4  ;;  %v623_v39 = vmul.f32 %v615_v10, %v591_v13  ;;  %v624_v24 = vmul.f32 %v616_v37, %v592_v31  ;;  %v625_v63 = vmul.f32 %v617_v48, %v593_v17  ;;  %v2888_v17 = vld [vmem:[#allocation61_spill] sm:$0xff]  ;;  %2897 = vst [vmem:[#allocation21_spill] sm:$0xff] %v2140_v14  ;;  %v1167_v10 = vld [vmem:[#allocation5 + $0x8] sm:$0xff] }
  0xa9   :  { %v626_v47 = vmul.f32 %v618_v57, %v594_v34  ;;  %v627_v26 = vmul.f32 %v619_v22, %v595_v35  ;;  %v628_v59 = vmul.f32 %v620_v23, %v596_v53  ;;  %v1121_v2 = vadd.f32 -0.5, %v597_v62  ;;  %v2110_v62 = vld [vmem:[#allocation2 + $0x150] sm:$0xff]  ;;  %v2144_v3 = vld [vmem:[#allocation2 + $0x178] sm:$0xff] }
  0xaa   :  { %v1122_v27 = vadd.f32 -0.5, %v598_v40  ;;  %v1123_v1 = vadd.f32 -0.5, %v599_v56  ;;  %v1124_v41 = vadd.f32 -0.5, %v600_v38  ;;  %v1125_v8 = vadd.f32 -0.5, %v601_v46  ;;  %2890 = vst [vmem:[#allocation20_spill] sm:$0xff] %v2110_v62  ;;  %v2112_v40 = vld [vmem:[#allocation2 + $0x158] sm:$0xff] }
  0xab   :  { %v1126_v16 = vadd.f32 -0.5, %v602_v15  ;;  %v1127_v44 = vadd.f32 -0.5, %v603_v43  ;;  %v1128_v32 = vadd.f32 -0.5, %v604_v21  ;;  %v637_v6 = vsel %vm1985_vm14, %v621_v60, %v1121_v2  ;;  %2891 = vst [vmem:[#allocation32_spill] sm:$0xff] %v2112_v40  ;;  %v2893_v38 = vld [vmem:[#allocation63_spill] sm:$0xff]  ;;  %v2128_v15 = vld [vmem:[#allocation2 + $0x160] sm:$0xff] }
  0xac   :  { %v638_v0 = vsel %vm1989_vm15, %v622_v12, %v1122_v27  ;;  %v639_v48 = vsel %vm1993_vm0, %v623_v39, %v1123_v1  ;;  %v640_v57 = vsel %vm1997_vm1, %v624_v24, %v1124_v41  ;;  %v641_v22 = vsel %vm2002_vm2, %v625_v63, %v1125_v8  ;;  %v2078_v8 = vld [vmem:[#allocation2 + $0x140] sm:$0xff]  ;;  %v2886_v27 = vld [vmem:[#allocation59_spill] sm:$0xff]  ;;  %2894 = vst [vmem:[#allocation42_spill] sm:$0xff] %v2128_v15  ;;  %v2895_v21 = vld [vmem:[#allocation24_spill] sm:$0xff] }
  0xad   :  { %v642_v37 = vsel %vm2008_vm4, %v626_v47, %v1126_v16  ;;  %v643_v23 = vsel %vm2012_vm13, %v627_v26, %v1127_v44  ;;  %v644_v60 = vsel %vm2016_vm7, %v628_v59, %v1128_v32  ;;  %v645_v2 = vadd.f32 %v641_v22, %v637_v6  ;;  %2884 = vst [vmem:[#allocation18_spill] sm:$0xff] %v2078_v8  ;;  %v2885_v41 = vld [vmem:[#allocation58_spill] sm:$0xff]  ;;  %v1169_v22 = vld [vmem:[#allocation5 + $0x18] sm:$0xff] }
  0xae   :  { %v2048_v39 = vsel %vm2666_vm3, %v1977_v9, %v1867_v51  ;;  %v652_v24 = vadd.f32 %v642_v37, %v638_v0  ;;  %v659_v12 = vadd.f32 %v643_v23, %v639_v48  ;;  %v666_v63 = vadd.f32 %v644_v60, %v640_v57  ;;  %v1166_v6 = vld [vmem:[#allocation5] sm:$0xff]  ;;  %2899 = vst [vmem:[#allocation43_spill] sm:$0xff] %v2144_v3  ;;  %v1168_v48 = vld [vmem:[#allocation5 + $0x10] sm:$0xff] }
  0xaf   :  { %v2055_v26 = vsel %vm2665_vm6, %v1979_v50, %v1876_v42  ;;  %v2062_v59 = vsel %vm2664_vm5, %v1981_v18, %v1883_v29  ;;  %v2069_v47 = vsel %vm2663_vm12, %v1983_v5, %v1890_v54  ;;  %v646_v55 = vrot.slane %v645_v2, 4 }
  0xb0   :  { %v2076_v36 = vsel %vm2666_vm3, %v2883_v52, %v1899_v19  ;;  %v653_v32 = vrot.slane %v652_v24, 4  ;;  %v660_v44 = vrot.slane %v659_v12, 4  ;;  %v667_v16 = vrot.slane %v666_v63, 4  ;;  %v2887_v19 = vld [vmem:[#allocation60_spill] sm:$0xff] }
  0xb1   :  { %v2085_v1 = vsel %vm2665_vm6, %v2885_v41, %v1912_v28  ;;  %v2092_v4 = vsel %vm2664_vm5, %v2886_v27, %v1919_v33  ;;  %v2099_v13 = vsel %vm2663_vm12, %v2887_v19, %v1946_v30  ;;  %v647_v31 = vadd.f32 %v646_v55, %v645_v2  ;;  %v2108_v33 = vld [vmem:[#allocation2 + $0x148] sm:$0xff]  ;;  %v2892_v30 = vld [vmem:[#allocation62_spill] sm:$0xff] }
  0xb2   :  { %v2106_v28 = vsel %vm2666_vm3, %v2888_v17, %v1957_v45  ;;  %v654_v34 = vadd.f32 %v653_v32, %v652_v24  ;;  %v661_v35 = vadd.f32 %v660_v44, %v659_v12  ;;  %v668_v53 = vadd.f32 %v667_v16, %v666_v63  ;;  %2889 = vst [vmem:[#allocation19_spill] sm:$0xff] %v2108_v33  ;;  %v1170_v24 = vld [vmem:[#allocation5 + $0x20] sm:$0xff]  ;;  %v1171_v55 = vld [vmem:[#allocation5 + $0x28] sm:$0xff]  ;;  %v1172_v32 = vld [vmem:[#allocation5 + $0x30] sm:$0xff] }
  0xb3   :  { %v2119_v56 = vsel %vm2665_vm6, %v2892_v30, %v1963_v61  ;;  %v2126_v45 = vsel %vm2664_vm5, %v2893_v38, %v1969_v20  ;;  %v648_v46 = vrot.slane %v647_v31, 2  ;;  %v2131_v43 = vsub.f32 %v2078_v8, %v1166_v6  ;;  %v2142_v20 = vld [vmem:[#allocation2 + $0x170] sm:$0xff] }
  0xb4   :  { %v2138_v61 = vsel %vm2663_vm12, %v2896_v25, %v2895_v21  ;;  %v655_v7 = vrot.slane %v654_v34, 2  ;;  %v662_v58 = vrot.slane %v661_v35, 2  ;;  %v669_v49 = vrot.slane %v668_v53, 2  ;;  %2898 = vst [vmem:[#allocation22_spill] sm:$0xff] %v2142_v20 }
  0xb5   :  { %v649_v11 = vadd.f32 %v648_v46, %v647_v31  ;;  %v2147_v0 = vsub.f32 %v2108_v33, %v1167_v10  ;;  %v2150_v57 = vsub.f32 %v2110_v62, %v1168_v48  ;;  %v2153_v37 = vsub.f32 %v2112_v40, %v1169_v22  ;;  %v1173_v31 = vld [vmem:[#allocation5 + $0x38] sm:$0xff] }
  0xb6   :  { %v656_v23 = vadd.f32 %v655_v7, %v654_v34  ;;  %v663_v60 = vadd.f32 %v662_v58, %v661_v35  ;;  %v670_v2 = vadd.f32 %v669_v49, %v668_v53  ;;  %v2156_v12 = vsub.f32 %v2128_v15, %v1170_v24 }
  0xb7   :  { %v650_v63 = vrot.slane %v649_v11, 1  ;;  %v731_v52 = vsub.f32 %v2140_v14, %v1171_v55  ;;  %v732_v44 = vsub.f32 %v2142_v20, %v1172_v32  ;;  %v734_v16 = vand.u32 2147483647, %v2131_v43 }
  0xb8   :  { %v657_v41 = vrot.slane %v656_v23, 1  ;;  %v664_v27 = vrot.slane %v663_v60, 1  ;;  %v671_v19 = vrot.slane %v670_v2, 1  ;;  %v733_v17 = vsub.f32 %v2144_v3, %v1173_v31 }
  0xb9   :  { %v651_v34 = vadd.f32 %v650_v63, %v649_v11  ;;  %v735_v35 = vand.u32 2147483647, %v2147_v0  ;;  %v736_v53 = vand.u32 2147483647, %v2150_v57  ;;  %v737_v30 = vand.u32 2147483647, %v2153_v37 }
  0xba   :  { %v658_v38 = vadd.f32 %v657_v41, %v656_v23  ;;  %v665_v46 = vadd.f32 %v664_v27, %v663_v60  ;;  %v672_v6 = vadd.f32 %v671_v19, %v670_v2  ;;  %v738_v21 = vand.u32 2147483647, %v2156_v12 }
  0xbb   :  { %v2166_v25 = vmul.f32 0.0625, %v651_v34  ;;  %v739_v7 = vand.u32 2147483647, %v731_v52  ;;  %v740_v58 = vand.u32 2147483647, %v732_v44  ;;  %vm2168_vm7 = vcmp.lt.f32.partialorder %v734_v16, 1.0 }
  0xbc   :  { %v2172_v11 = vmul.f32 0.0625, %v658_v38  ;;  %v2174_v10 = vmul.f32 0.0625, %v665_v46  ;;  %v2176_v48 = vmul.f32 0.0625, %v672_v6  ;;  %v741_v22 = vand.u32 2147483647, %v733_v17 }
  0xbd   :  { %vm677_vm13 = vcmp.lt.f32.partialorder %v2166_v25, %v2048_v39  ;;  %vm2180_vm14 = vcmp.lt.f32.partialorder %v735_v35, 1.0  ;;  %vm2184_vm15 = vcmp.lt.f32.partialorder %v736_v53, 1.0  ;;  %vm2188_vm0 = vcmp.lt.f32.partialorder %v737_v30, 1.0 }
  0xbe   :  { %vm678_vm1 = vcmp.lt.f32.partialorder %v2172_v11, %v2055_v26  ;;  %vm679_vm2 = vcmp.lt.f32.partialorder %v2174_v10, %v2062_v59  ;;  %vm680_vm4 = vcmp.lt.f32.partialorder %v2176_v48, %v2069_v47  ;;  %v750_v24 = vmul.f32 0.5, %v2131_v43 }
  0xbf   :  { %vm2199_vm12 = vcmp.lt.f32.partialorder %v738_v21, 1.0  ;;  %v751_v55 = vmul.f32 0.5, %v2147_v0  ;;  %v752_v32 = vmul.f32 0.5, %v2150_v57  ;;  %v753_v41 = vmul.f32 0.5, %v2153_v37 }
  0xc0   :  { %v2211_v27 = vsel %vm677_vm13, %v2166_v25, %v2048_v39  ;;  %vm2213_vm5 = vcmp.lt.f32.partialorder %v739_v7, 1.0  ;;  %vm2217_vm6 = vcmp.lt.f32.partialorder %v740_v58, 1.0  ;;  %vm2221_vm3 = vcmp.lt.f32.partialorder %v741_v22, 1.0 }
  0xc1   :  { %2910 = vst [vmem:[#allocation44_spill] sm:$0xff] %v2211_v27  ;;  %v2230_v38 = vsel %vm678_vm1, %v2172_v11, %v2055_v26  ;;  %v2237_v46 = vsel %vm679_vm2, %v2174_v10, %v2062_v59  ;;  %v2244_v6 = vsel %vm680_vm4, %v2176_v48, %v2069_v47  ;;  %v754_v54 = vmul.f32 0.5, %v2156_v12 }
  0xc2   :  { %2917 = vst [vmem:[#allocation45_spill] sm:$0xff] %v2230_v38  ;;  %2918 = vst [vmem:[#allocation46_spill] sm:$0xff] %v2237_v46  ;;  %v755_v5 = vmul.f32 0.5, %v731_v52  ;;  %v756_v29 = vmul.f32 0.5, %v732_v44  ;;  %v757_v18 = vmul.f32 0.5, %v733_v17  ;;  %v758_v42 = vmul.f32 %v750_v24, %v2131_v43 }
  0xc3   :  { %2919 = vst [vmem:[#allocation56_spill] sm:$0xff] %v2244_v6  ;;  %v759_v50 = vmul.f32 %v751_v55, %v2147_v0  ;;  %v760_v51 = vmul.f32 %v752_v32, %v2150_v57  ;;  %v761_v9 = vmul.f32 %v753_v41, %v2153_v37  ;;  %v762_v3 = vmul.f32 %v754_v54, %v2156_v12 }
  0xc4   :  { %v763_v20 = vmul.f32 %v755_v5, %v731_v52  ;;  %v764_v14 = vmul.f32 %v756_v29, %v732_v44  ;;  %v765_v15 = vmul.f32 %v757_v18, %v733_v17  ;;  %v1129_v40 = vadd.f32 -0.5, %v734_v16  ;;  %v72_v16 = vld [vmem:[%s2587_s3] sm:$0xf]  ;;  %s1298_s3 = smov [#allocation8]  }
  0xc5   :  { %v1130_v62 = vadd.f32 -0.5, %v735_v35  ;;  %v1131_v33 = vadd.f32 -0.5, %v736_v53  ;;  %v1132_v8 = vadd.f32 -0.5, %v737_v30  ;;  %v1133_v6 = vadd.f32 -0.5, %v738_v21  ;;  %v2925_v53 = vld [vmem:[#allocation39_spill] sm:$0xff]  ;;  %s1062_s7 = sshll.u32 %s1298_s3, 4  ;;  %s1063_s7 = int_to_ptr.vmem [resolvable:$true] %s1062_s7 }
  0xc6   :  { %v1134_v46 = vadd.f32 -0.5, %v739_v7  ;;  %v1135_v38 = vadd.f32 -0.5, %v740_v58  ;;  %v1136_v27 = vadd.f32 -0.5, %v741_v22  ;;  %v774_v43 = vsel %vm2168_vm7, %v758_v42, %v1129_v40  ;;  %s1241_s8 = scalar_lea.vmem %s1063_s7, 1024  ;;  %p1246_p11 = scmp.lt.s32.totalorder %s1063_s7, %s1063_s7 }
  0xc7   :  { %v775_v0 = vsel %vm2180_vm14, %v759_v50, %v1130_v62  ;;  %v776_v54 = vsel %vm2184_vm15, %v760_v51, %v1131_v33  ;;  %v777_v29 = vsel %vm2188_vm0, %v761_v9, %v1132_v8  ;;  %v778_v18 = vsel %vm2199_vm12, %v762_v3, %v1133_v6  ;;  %v2920_v33 = vld [vmem:[#allocation35_spill] sm:$0xff]  ;;  %v2921_v8 = vld [vmem:[#allocation37_spill] sm:$0xff]  ;;  %p1242_p10 = scmp.ne.s32.totalorder %s1063_s7, %s1241_s8  ;;  %p1247_p12 = scmp.lt.s32.totalorder %s1241_s8, %s1241_s8 }
  0xc8   :  { %v779_v5 = vsel %vm2213_vm5, %v763_v20, %v1134_v46  ;;  %v780_v57 = vsel %vm2217_vm6, %v764_v14, %v1135_v38  ;;  %v781_v42 = vsel %vm2221_vm3, %v765_v15, %v1136_v27  ;;  %v782_v40 = vadd.f32 %v778_v18, %v774_v43  ;;  %v2922_v15 = vld [vmem:[#allocation30_spill] sm:$0xff]  ;;  %v2328_v38 = vld [vmem:[#allocation7 + $0x8] sm:$0x3f] }
  0xc9   :  { %v789_v50 = vadd.f32 %v779_v5, %v775_v0  ;;  %v796_v62 = vadd.f32 %v780_v57, %v776_v54  ;;  %v803_v37 = vadd.f32 %v781_v42, %v777_v29  ;;  %v948_v51 = vlaneseq  ;;  %v2336_v54 = vld [vmem:[#allocation7 + $0x10] sm:$0x3f]  ;;  %v2926_v42 = vld [vmem:[#allocation31_spill] sm:$0xff]  ;;  %p1248_p13 = por %p1247_p12, %p1246_p11 }
  0xca   :  { %v2273_v9 = vsel %vm677_vm13, %v2920_v33, %v2076_v36  ;;  %v2280_v14 = vsel %vm678_vm1, %v2921_v8, %v2085_v1  ;;  %v2287_v20 = vsel %vm679_vm2, %v2922_v15, %v2092_v4  ;;  %v783_v3 = vrot.slane %v782_v40, 4  ;;  %v2923_v1 = vld [vmem:[#allocation38_spill] sm:$0xff]  ;;  %v2924_v4 = vld [vmem:[#allocation23_spill] sm:$0xff] }
  0xcb   :  { %v790_v12 = vrot.slane %v789_v50, 4  ;;  %v797_v52 = vrot.slane %v796_v62, 4  ;;  %v804_v44 = vrot.slane %v803_v37, 4  ;;  %v2290_v36 = vshrl.u32 %v948_v51, 7  ;;  %p1249_p0 = pnand %p1248_p13, %p1242_p10 }
  0xcc   :  { %v2300_v17 = vsel %vm680_vm4, %v2923_v1, %v2099_v13  ;;  %v2307_v35 = vsel %vm677_vm13, %v2924_v4, %v2106_v28  ;;  %v2314_v30 = vsel %vm678_vm1, %v2925_v53, %v2119_v56  ;;  %v784_v21 = vadd.f32 %v783_v3, %v782_v40 }
  0xcd   :  { %v791_v7 = vadd.f32 %v790_v12, %v789_v50  ;;  %v798_v58 = vadd.f32 %v797_v52, %v796_v62  ;;  %v805_v49 = vadd.f32 %v804_v44, %v803_v37  ;;  %v950_v13 = vsub.s32 0, %v2290_v36  ;;  %v2927_v50 = vld [vmem:[#allocation40_spill] sm:$0xff]  ;;  %v2928_v44 = vld [vmem:[#allocation57_spill] sm:$0xff] }
  0xce   :  { %v785_v22 = vrot.slane %v784_v21, 2  ;;  %v954_v23 = vsub.s32 1, %v2290_v36  ;;  %v958_v60 = vsub.s32 2, %v2290_v36  ;;  %v962_v28 = vsub.s32 3, %v2290_v36 }
  0xcf   :  { %v792_v2 = vrot.slane %v791_v7, 2  ;;  %v799_v24 = vrot.slane %v798_v58, 2  ;;  %v806_v63 = vrot.slane %v805_v49, 2  ;;  %v2320_v55 = vrot.slane %v72_v16, %v950_v13 }
  0xd0   :  { %v786_v56 = vadd.f32 %v785_v22, %v784_v21  ;;  %v2322_v32 = vrot.slane %v72_v16, %v954_v23  ;;  %v2324_v41 = vrot.slane %v72_v16, %v958_v60  ;;  %vm972_vm12 = vcmask 1040384   ;;  %v2930_v22 = vld [vmem:[#allocation45_spill] sm:$0xff]  ;;  %v2931_v23 = vld [vmem:[#allocation46_spill] sm:$0xff]  ;;  %v2932_v60 = vld [vmem:[#allocation56_spill] sm:$0xff] }
  0xd1   :  { %v793_v27 = vadd.f32 %v792_v2, %v791_v7  ;;  %v800_v19 = vadd.f32 %v799_v24, %v798_v58  ;;  %v807_v31 = vadd.f32 %v806_v63, %v805_v49  ;;  %v1021_v34 = vsel %vm972_vm12, %v2320_v55, 0.0  ;;  %v2929_v7 = vld [vmem:[#allocation44_spill] sm:$0xff] }
  0xd2   :  { %v787_v46 = vrot.slane %v786_v56, 1  ;;  %v2330_v6 = vrot.slane %v72_v16, %v962_v28  ;;  %v1022_v43 = vsel %vm972_vm12, %v2322_v32, 0.0  ;;  %v1024_v0 = vsel %vm972_vm12, %v2324_v41, 0.0 }
  0xd3   :  { %v794_v29 = vrot.slane %v793_v27, 1  ;;  %v801_v18 = vrot.slane %v800_v19, 1  ;;  %v808_v5 = vrot.slane %v807_v31, 1  ;;  %v1023_v57 = vadd.f32 %v1022_v43, %v1021_v34  ;;  %v2935_v34 = vld [vmem:[#allocation20_spill] sm:$0xff] }
  0xd4   :  { %v715_v40 = vsel %vm679_vm2, %v2926_v42, %v2126_v45  ;;  %v716_v62 = vsel %vm680_vm4, %v2927_v50, %v2138_v61  ;;  %v788_v37 = vadd.f32 %v787_v46, %v786_v56  ;;  %v1026_v33 = vsel %vm972_vm12, %v2330_v6, 0.0  ;;  %v2933_v56 = vld [vmem:[#allocation18_spill] sm:$0xff]  ;;  %v2936_v43 = vld [vmem:[#allocation32_spill] sm:$0xff]  ;;  %v2431_v42 = vld [vmem:[#allocation7 + $0x18] sm:$0x3f] }
  0xd5   :  { %v795_v8 = vadd.f32 %v794_v29, %v793_v27  ;;  %v802_v15 = vadd.f32 %v801_v18, %v800_v19  ;;  %v809_v3 = vadd.f32 %v808_v5, %v807_v31  ;;  %v1025_v12 = vadd.f32 %v1024_v0, %v1023_v57  ;;  %v2934_v19 = vld [vmem:[#allocation19_spill] sm:$0xff] }
  0xd6   :  { %v2350_v52 = vmul.f32 0.0625, %v788_v37  ;;  %v856_v16 = vrot.slane %v2928_v44, 4  ;;  %v862_v45 = vsel %vm854_vm8, %v2328_v38, -inf  ;;  %v869_v1 = vsel %vm854_vm8, %v2336_v54, -inf  ;;  %v2940_v57 = vld [vmem:[#allocation43_spill] sm:$0xff] }
  0xd7   :  { %v2357_v4 = vmul.f32 0.0625, %v795_v8  ;;  %v2359_v61 = vmul.f32 0.0625, %v802_v15  ;;  %v2361_v53 = vmul.f32 0.0625, %v809_v3  ;;  %v1027_v21 = vadd.f32 %v1026_v33, %v1025_v12 }
  0xd8   :  { %vm814_vm5 = vcmp.lt.f32.partialorder %v2350_v52, %v2929_v7  ;;  %v857_v58 = vmax.f32 %v2928_v44, %v856_v16  ;;  %v863_v49 = vrot.slane %v862_v45, 4  ;;  %v870_v13 = vrot.slane %v869_v1, 4 }
  0xd9   :  { %vm815_vm6 = vcmp.lt.f32.partialorder %v2357_v4, %v2930_v22  ;;  %vm816_vm3 = vcmp.lt.f32.partialorder %v2359_v61, %v2931_v23  ;;  %vm817_vm7 = vcmp.lt.f32.partialorder %v2361_v53, %v2932_v60  ;;  %v818_v28 = vsel %vm814_vm5, %v2350_v52, %v2929_v7  ;;  %1028 = vadd.xlane.f32.xlu1 %v1027_v21 }
  0xda   :  { %v819_v2 = vsel %vm815_vm6, %v2357_v4, %v2930_v22  ;;  %v820_v24 = vsel %vm816_vm3, %v2359_v61, %v2931_v23  ;;  %v821_v63 = vsel %vm817_vm7, %v2361_v53, %v2932_v60  ;;  %v846_v27 = vsel %vm814_vm5, %v2933_v56, %v2273_v9  ;;  %v2937_v9 = vld [vmem:[#allocation42_spill] sm:$0xff] }
  0xdb   :  { %v847_v31 = vsel %vm815_vm6, %v2934_v19, %v2280_v14  ;;  %v848_v46 = vsel %vm816_vm3, %v2935_v34, %v2287_v20  ;;  %v849_v0 = vsel %vm817_vm7, %v2936_v43, %v2300_v17  ;;  %v850_v29 = vsel %vm814_vm5, %v2937_v9, %v2307_v35  ;;  %939 = vst [vmem:[#allocation8] sm:$0xff] %v846_v27  ;;  %v2938_v14 = vld [vmem:[#allocation21_spill] sm:$0xff]  ;;  %v2939_v20 = vld [vmem:[#allocation22_spill] sm:$0xff] }
  0xdc   :  { %v851_v18 = vsel %vm815_vm6, %v2938_v14, %v2314_v30  ;;  %v852_v5 = vsel %vm816_vm3, %v2939_v20, %v715_v40  ;;  %v853_v17 = vsel %vm817_vm7, %v2940_v57, %v716_v62  ;;  %940 = vst [vmem:[#allocation8 + $0x8] sm:$0xff] %v847_v31  ;;  %941 = vst [vmem:[#allocation8 + $0x10] sm:$0xff] %v848_v46  ;;  %v858_v8 = vrot.slane %v857_v58, 2 }
  0xdd   :  { %942 = vst [vmem:[#allocation8 + $0x18] sm:$0xff] %v849_v0  ;;  %943 = vst [vmem:[#allocation8 + $0x20] sm:$0xff] %v850_v29  ;;  %v968_v35 = vmul.f32 %v2320_v55, %v818_v28  ;;  %v969_v30 = vmul.f32 %v2322_v32, %v819_v2  ;;  %v970_v40 = vmul.f32 %v2324_v41, %v820_v24  ;;  %v876_v44 = vsel %vm854_vm8, %v2431_v42, -inf }
  0xde   :  { %944 = vst [vmem:[#allocation8 + $0x28] sm:$0xff] %v851_v18  ;;  %945 = vst [vmem:[#allocation8 + $0x30] sm:$0xff] %v852_v5  ;;  %v971_v50 = vmul.f32 %v2330_v6, %v821_v63  ;;  %v864_v3 = vmax.f32 %v862_v45, %v863_v49  ;;  %v871_v12 = vmax.f32 %v869_v1, %v870_v13  ;;  %v877_v28 = vrot.slane %v876_v44, 4  ;;  %v2941_v13 = vld [vmem:[#allocation51_spill] sm:$0xff] }
  0xdf   :  { %946 = vst [vmem:[#allocation8 + $0x38] sm:$0xff] %v853_v17  ;;  %v973_v37 = vsel %vm972_vm12, %v968_v35, 0.0  ;;  %v974_v62 = vsel %vm972_vm12, %v969_v30, 0.0  ;;  %v976_v33 = vsel %vm972_vm12, %v970_v40, 0.0  ;;  %v859_v21 = vmax.f32 %v857_v58, %v858_v8 }
  0xe0   :  { %v975_v15 = vadd.f32 %v974_v62, %v973_v37  ;;  %v978_v16 = vsel %vm972_vm12, %v971_v50, 0.0  ;;  %v865_v24 = vrot.slane %v864_v3, 2  ;;  %v872_v63 = vrot.slane %v871_v12, 2 }
  0xe1   :  { %v860_v56 = vrot.slane %v859_v21, 1  ;;  %v878_v27 = vmax.f32 %v876_v44, %v877_v28  ;;  %v278_v30 = vrot.slane %v2941_v13, 7  ;;  %v279_v50 = vrot.slane %v2328_v38, 7 }
  0xe2   :  { %v977_v2 = vadd.f32 %v976_v33, %v975_v15  ;;  %v866_v31 = vmax.f32 %v864_v3, %v865_v24  ;;  %v873_v34 = vmax.f32 %v871_v12, %v872_v63  ;;  %v280_v37 = vrot.slane %v2336_v54, 7  ;;  %v2957_v33 = vld [vmem:[#allocation26_spill] sm:$0xff] }
  0xe3   :  { %v2442_v46 = vmax.f32 %v859_v21, %v860_v56  ;;  %v879_v43 = vrot.slane %v878_v27, 2  ;;  %v286_v8 = vsel %vm266_vm9, %v2941_v13, %v278_v30  ;;  %v281_v15 = vrot.slane %v2431_v42, 7 }
  0xe4   :  { %v979_v19 = vadd.f32 %v978_v16, %v977_v2  ;;  %v867_v45 = vrot.slane %v866_v31, 1  ;;  %v874_v1 = vrot.slane %v873_v34, 1  ;;  %v287_v16 = vsel %vm267_vm10, %v2328_v38, %v279_v50  ;;  %v2954_v50 = vld [vmem:[#allocation33_spill] sm:$0xff] }
  0xe5   :  { %v880_v49 = vmax.f32 %v878_v27, %v879_v43  ;;  %v883_v0 = vsub.f32 %v2941_v13, %v2442_v46  ;;  %v288_v2 = vsel %vm268_vm11, %v2336_v54, %v280_v37  ;;  %v415_v24 = vrot.slane %v286_v8, 7  ;;  %v2955_v37 = vld [vmem:[#allocation66_spill] sm:$0xff]  ;;  %v2958_v8 = vld [vmem:[#allocation67_spill] sm:$0xff] }
  0xe6   :  { %980 = vadd.xlane.f32.xlu0 %v979_v19  ;;  %v2446_v58 = vmax.f32 %v866_v31, %v867_v45  ;;  %v2448_v9 = vmax.f32 %v873_v34, %v874_v1  ;;  %v2948_v19 = vld [vmem:[#allocation55_spill] sm:$0xff]  ;;  %v2949_v31 = vld [vmem:[#allocation50_spill] sm:$0xff]  ;;  %v416_v43 = vrot.slane %v287_v16, 7  ;;  %v417_v45 = vrot.slane %v288_v2, 7 }
  0xe7   :  { %v881_v29 = vrot.slane %v880_v49, 1  ;;  %v887_v14 = vmul.f32 1.442695, %v883_v0  ;;  %vm2950_vm9 = vcmp.lt.f32.partialorder %v2948_v19, %v2949_v31  ;;  %vm2956_vm11 = vcmp.lt.f32.partialorder %v2954_v50, %v2955_v37  ;;  %v2967_v50 = vld [vmem:[#allocation28_spill] sm:$0xff] }
  0xe8   :  { %v884_v18 = vsub.f32 %v2328_v38, %v2446_v58  ;;  %v885_v20 = vsub.f32 %v2336_v54, %v2448_v9  ;;  %v289_v34 = vsel %vm2950_vm9, %v2431_v42, %v281_v15  ;;  %v424_v62 = vsel %vm2956_vm11, %v2328_v38, %v416_v43 }
  0xe9   :  { %v2454_v5 = vmax.f32 %v880_v49, %v881_v29  ;;  %1150 = vpow2.f32 %v887_v14  ;;  %v2951_v29 = vld [vmem:[#allocation25_spill] sm:$0xff]  ;;  %vm2959_vm14 = vcmp.lt.f32.partialorder %v2957_v33, %v2958_v8  ;;  %v553_v31 = vrot.slane %v424_v62, 7  ;;  %v2969_v33 = vld [vmem:[#allocation16_spill] sm:$0xff] }
  0xea   :  { %v889_v57 = vmul.f32 1.442695, %v884_v18  ;;  %v891_v17 = vmul.f32 1.442695, %v885_v20  ;;  %v2952_v14 = vld [vmem:[#allocation65_spill] sm:$0xff]  ;;  %v425_v15 = vsel %vm2959_vm14, %v2336_v54, %v417_v45  ;;  %v2970_v8 = vld [vmem:[#allocation36_spill] sm:$0xff] }
  0xeb   :  { %v886_v35 = vsub.f32 %v2431_v42, %v2454_v5  ;;  %vm2953_vm10 = vcmp.lt.f32.partialorder %v2951_v29, %v2952_v14  ;;  %v1174_v45 = vld [vmem:[#allocation7] sm:$0x3f]  ;;  %vm2971_vm9 = vcmp.lt.f32.partialorder %v2969_v33, %v2970_v8 }
  0xec   :  { %1152 = vpow2.f32 %v889_v57  ;;  %v423_v18 = vsel %vm2953_vm10, %v2941_v13, %v415_v24 }
  0xed   :  { %1154 = vpow2.f32 %v891_v17  ;;  %v893_v40 = vmul.f32 1.442695, %v886_v35  ;;  %v418_v35 = vrot.slane %v289_v34, 7  ;;  %v552_v12 = vrot.slane %v423_v18, 7 }
  0xee   :  { %v554_v34 = vrot.slane %v425_v15, 7 }
  0xef   :  { %1156 = vpow2.f32 %v893_v40 }
  0xf0   :  { %v562_v15 = vsel %vm2971_vm9, %v2336_v54, %v554_v34 }
  0xf3   :  { %v1151_v3 = vpop.eup %1150 }
  0xf4   :  { %v895_v63 = vsel %vm854_vm8, %v1151_v3, 0.0 }
  0xf5   :  { %v896_v56 = vrot.slane %v895_v63, 4 }
  0xf6   :  { %v1153_v27 = vpop.eup %1152 }
  0xf7   :  { %v1155_v1 = vpop.eup %1154  ;;  %v897_v49 = vadd.f32 %v896_v56, %v895_v63  ;;  %v902_v0 = vsel %vm854_vm8, %v1153_v27, 0.0  ;;  %v2960_v56 = vld [vmem:[#allocation34_spill] sm:$0xff]  ;;  %v2961_v27 = vld [vmem:[#allocation68_spill] sm:$0xff] }
  0xf8   :  { %v903_v20 = vrot.slane %v902_v0, 4  ;;  %v909_v57 = vsel %vm854_vm8, %v1155_v1, 0.0  ;;  %vm2962_vm15 = vcmp.lt.f32.partialorder %v2960_v56, %v2961_v27  ;;  %v2963_v1 = vld [vmem:[#allocation41_spill] sm:$0xff] }
  0xf9   :  { %v1157_v17 = vpop.eup %1156  ;;  %v898_v30 = vrot.slane %v897_v49, 2  ;;  %v910_v40 = vrot.slane %v909_v57, 4  ;;  %v426_v19 = vsel %vm2962_vm15, %v2431_v42, %v418_v35 }
  0xfa   :  { %v904_v3 = vadd.f32 %v903_v20, %v902_v0  ;;  %v916_v13 = vsel %vm854_vm8, %v1157_v17, 0.0  ;;  %v2964_v0 = vld [vmem:[#allocation27_spill] sm:$0xff] }
  0xfb   :  { %v899_v44 = vadd.f32 %v898_v30, %v897_v49  ;;  %v911_v16 = vadd.f32 %v910_v40, %v909_v57  ;;  %v917_v21 = vrot.slane %v916_v13, 4  ;;  %vm2965_vm8 = vcmp.lt.f32.partialorder %v2963_v1, %v2964_v0  ;;  %v2966_v40 = vld [vmem:[#allocation15_spill] sm:$0xff] }
  0xfc   :  { %v905_v28 = vrot.slane %v904_v3, 2  ;;  %v560_v29 = vsel %vm2965_vm8, %v1174_v45, %v552_v12  ;;  %v555_v57 = vrot.slane %v426_v19, 7  ;;  %vm2968_vm0 = vcmp.lt.f32.partialorder %v2966_v40, %v2967_v50  ;;  %v2972_v12 = vld [vmem:[#allocation17_spill] sm:$0xff] }
  0xfd   :  { %v900_v2 = vrot.slane %v899_v44, 1  ;;  %v912_v24 = vrot.slane %v911_v16, 2  ;;  %v918_v63 = vadd.f32 %v917_v21, %v916_v13  ;;  %v561_v35 = vsel %vm2968_vm0, %v2328_v38, %v553_v31 }
  0xfe   :  { %v906_v43 = vadd.f32 %v905_v28, %v904_v3  ;;  %v689_v37 = vrot.slane %v560_v29, 7  ;;  %v690_v21 = vrot.slane %v561_v35, 7 }
  0xff   :  { %v901_v49 = vadd.f32 %v900_v2, %v899_v44  ;;  %v913_v14 = vadd.f32 %v912_v24, %v911_v16  ;;  %v919_v18 = vrot.slane %v918_v63, 2  ;;  %v2973_v44 = vld [vmem:[#allocation29_spill] sm:$0xff]  ;;  %v691_v2 = vrot.slane %v562_v15, 7 }
 0x100   :  { %v907_v20 = vrot.slane %v906_v43, 1  ;;  %vm2974_vm10 = vcmp.lt.f32.partialorder %v2972_v12, %v2973_v44  ;;  %v697_v24 = vsel %vm677_vm13, %v1174_v45, %v689_v37  ;;  %v698_v56 = vsel %vm678_vm1, %v2328_v38, %v690_v21 }
 0x101   :  { %v914_v17 = vrot.slane %v913_v14, 1  ;;  %v920_v30 = vadd.f32 %v919_v18, %v918_v63  ;;  %1158 = vlog2.f32 %v901_v49  ;;  %v563_v16 = vsel %vm2974_vm10, %v2431_v42, %v555_v57 }
 0x102   :  { %v908_v62 = vadd.f32 %v907_v20, %v906_v43  ;;  %v692_v63 = vrot.slane %v563_v16, 7  ;;  %v826_v27 = vrot.slane %v697_v24, 7  ;;  %v699_v19 = vsel %vm679_vm2, %v2336_v54, %v691_v2 }
 0x103   :  { %v915_v3 = vadd.f32 %v914_v17, %v913_v14  ;;  %v921_v13 = vrot.slane %v920_v30, 1  ;;  %v827_v25 = vrot.slane %v698_v56, 7  ;;  %v828_v43 = vrot.slane %v699_v19, 7 }
 0x104   :  { %1160 = vlog2.f32 %v908_v62  ;;  %v700_v39 = vsel %vm680_vm4, %v2431_v42, %v692_v63  ;;  %v834_v26 = vsel %vm814_vm5, %v1174_v45, %v826_v27 }
 0x105   :  { %v922_v28 = vadd.f32 %v921_v13, %v920_v30  ;;  %1162 = vlog2.f32 %v915_v3  ;;  %v829_v29 = vrot.slane %v700_v39, 7  ;;  %v835_v10 = vsel %vm815_vm6, %v2328_v38, %v827_v25 }
 0x106   :  { %v836_v52 = vsel %vm816_vm3, %v2336_v54, %v828_v43 }
 0x107   :  { %1164 = vlog2.f32 %v922_v28  ;;  %v837_v38 = vsel %vm817_vm7, %v2431_v42, %v829_v29 }
 0x10b   :  { %v1159_v31 = vpop.eup %1158 }
 0x10c   :  { %v924_v34 = vmul.f32 0.6931472, %v1159_v31 }
 0x10e   :  { %v1161_v11 = vpop.eup %1160  ;;  %v931_v1 = vadd.f32 %v924_v34, %v2442_v46 }
 0x10f   :  { %v1163_v0 = vpop.eup %1162  ;;  %v926_v59 = vmul.f32 0.6931472, %v1161_v11 }
 0x110   :  { %v928_v47 = vmul.f32 0.6931472, %v1163_v0  ;;  %v935_v48 = vsub.f32 %v931_v1, %v834_v26 }
 0x111   :  { %v1165_v49 = vpop.eup %1164  ;;  %v932_v7 = vadd.f32 %v926_v59, %v2446_v58 }
 0x112   :  { %v930_v45 = vmul.f32 0.6931472, %v1165_v49  ;;  %v933_v46 = vadd.f32 %v928_v47, %v2448_v9  ;;  %v989_v14 = vmul.f32 %v2320_v55, %v935_v48 }
 0x113   :  { %v936_v4 = vsub.f32 %v932_v7, %v835_v10 }
 0x114   :  { %v934_v22 = vadd.f32 %v930_v45, %v2454_v5  ;;  %v937_v18 = vsub.f32 %v933_v46, %v836_v52  ;;  %v997_v20 = vrot.slane %v989_v14, 5 }
 0x115   :  { %v990_v61 = vmul.f32 %v2322_v32, %v936_v4 }
 0x116   :  { %v938_v54 = vsub.f32 %v934_v22, %v837_v38  ;;  %v991_v23 = vmul.f32 %v2324_v41, %v937_v18  ;;  %v1005_v9 = vsel %vm972_vm12, %v997_v20, 0.0 }
 0x117   :  { %v998_v58 = vrot.slane %v990_v61, 5 }
 0x118   :  { %v992_v55 = vmul.f32 %v2330_v6, %v938_v54  ;;  %v999_v57 = vrot.slane %v991_v23, 5 }
 0x119   :  { %v1006_v17 = vsel %vm972_vm12, %v998_v58, 0.0 }
 0x11a   :  { %v1000_v53 = vrot.slane %v992_v55, 5  ;;  %v1007_v60 = vadd.f32 %v1006_v17, %v1005_v9  ;;  %v1008_v42 = vsel %vm972_vm12, %v999_v57, 0.0 }
 0x11c   :  { %v1009_v5 = vadd.f32 %v1008_v42, %v1007_v60  ;;  %v1010_v30 = vsel %vm972_vm12, %v1000_v53, 0.0 }
 0x11e   :  { %v1011_v40 = vadd.f32 %v1010_v30, %v1009_v5 }
 0x120   :  { %1012 = vadd.xlane.f32.xlu0 %v1011_v40 }
 0x173   :  { %v981_v32 = vpop.xlane.xlu0 %980 }
 0x174   :  { %v982_v50 = vrot.slane %v981_v32, 4 }
 0x176   :  { %v983_v41 = vadd.f32 %v982_v50, %v981_v32 }
 0x177   :  { %1252 = shalt.err (!%p1249_p0)
}
 0x178   :  { %s1253_s11 = scalar_lea.hbm %s2588_s4, 1024 }
 0x179   :  { %p1254_p1 = scmp.ne.s32.totalorder %s2588_s4, %s1253_s11  ;;  %p1257_p2 = scmp.lt.u32.totalorder %s1253_s11, %s2588_s4 }
 0x17b   :  { %p1259_p3 = pnand %p1257_p2, %p1254_p1 }
 0x17d   :  { %1262 = shalt.err (!%p1259_p3)
}
 0x17e   :  { %1068 = dma.vmem_to_hbm [thread:$0]  %s1063_s7, 1024, %s2588_s4, [#allocation4], %s1295_s30, %s1295_s30, %s1296_s6   ;;  %v984_v6 = vrot.slane %v983_v41, 2  ;;  %v1029_v33 = vpop.xlane.xlu1 %1028  ;;  %v1040_v27 = vand.u32 127, %v948_v51  ;;  %vm1041_vm13 = vcmp.eq.s32.totalorder %v2290_v36, 0 }
 0x17f   :  { %v1030_v8 = vrot.slane %v1029_v33, 4  ;;  %s1299_s17 = smov [#allocation9]  }
 0x180   :  { %v985_v35 = vadd.f32 %v984_v6, %v983_v41  ;;  %vm1042_vm1 = vcmp.eq.s32.totalorder %v1040_v27, 0  ;;  %vm1046_vm2 = vcmp.eq.s32.totalorder %v1040_v27, 1  ;;  %vm1051_vm12 = vcmp.eq.s32.totalorder %v1040_v27, 2  ;;  %s1075_s18 = sshll.u32 %s1299_s17, 4  ;;  %s1076_s18 = int_to_ptr.vmem [resolvable:$true] %s1075_s18 }
 0x181   :  { %v1031_v15 = vadd.f32 %v1030_v8, %v1029_v33  ;;  %vm1043_vm4 = vmand %vm1041_vm13, %vm1042_vm1  ;;  %s1263_s19 = scalar_lea.vmem %s1076_s18, 128  ;;  %p1268_p5 = scmp.lt.s32.totalorder %s1076_s18, %s1076_s18 }
 0x182   :  { %v986_v37 = vrot.slane %v985_v35, 1  ;;  %vm1047_vm5 = vmand %vm1041_vm13, %vm1046_vm2  ;;  %p1264_p4 = scmp.ne.s32.totalorder %s1076_s18, %s1263_s19  ;;  %p1269_p6 = scmp.lt.s32.totalorder %s1263_s19, %s1263_s19 }
 0x183   :  { %v1032_v3 = vrot.slane %v1031_v15, 2  ;;  %vm1052_vm6 = vmand %vm1041_vm13, %vm1051_vm12 }
 0x184   :  { %v987_v62 = vadd.f32 %v986_v37, %v985_v35  ;;  %p1270_p7 = por %p1269_p6, %p1268_p5 }
 0x185   :  { %v1033_v16 = vadd.f32 %v1032_v3, %v1031_v15 }
 0x186   :  { %1137 = vpush %v987_v62  ;;  %p1271_p8 = pnand %p1270_p7, %p1264_p4 }
 0x187   :  { %v1034_v2 = vrot.slane %v1033_v16, 1 }
 0x189   :  { %v1035_v56 = vadd.f32 %v1034_v2, %v1033_v16 }
 0x1ad   :  { %v1013_v13 = vpop.xlane.xlu0 %1012 }
 0x1ae   :  { %v1014_v12 = vrot.slane %v1013_v13, 4 }
 0x1b0   :  { %v1015_v44 = vadd.f32 %v1014_v12, %v1013_v13 }
 0x1b2   :  { %v1016_v21 = vrot.slane %v1015_v44, 2 }
 0x1b4   :  { %v1017_v28 = vadd.f32 %v1016_v21, %v1015_v44 }
 0x1b6   :  { %v1018_v24 = vrot.slane %v1017_v28, 1 }
 0x1b7   :  { %s1138_s4 = spop %1137 }
 0x1b8   :  { %v1019_v63 = vadd.f32 %v1018_v24, %v1017_v28  ;;  %v1044_v19 = vstv %s1138_s4 }
 0x1b9   :  { %v1045_v39 = vsel %vm1043_vm4, %v1044_v19, 0.0 }
 0x1ba   :  { %1139 = vpush %v1019_v63 }
 0x1bb   :  { %1141 = vpush %v1035_v56 }
 0x1eb   :  { %s1140_s30 = spop %1139 }
 0x1ec   :  { %v1048_v31 = vstv %s1140_s30  ;;  %s1142_s6 = spop %1141 }
 0x1ed   :  { %v1049_v25 = vsel %vm1047_vm5, %v1048_v31, 0.0  ;;  %v1053_v34 = vstv %s1142_s6 }
 0x1ee   :  { %v1050_v43 = vadd.f32 %v1049_v25, %v1045_v39  ;;  %v1054_v51 = vsel %vm1052_vm6, %v1053_v34, 0.0 }
 0x1f0   :  { %v1055_v26 = vadd.f32 %v1054_v51, %v1050_v43 }
 0x1f2   :  { %1056 = vst [vmem:[#allocation9] sm:$0xff] %v1055_v26 }
 0x1f3   :  { %1274 = shalt.err (!%p1271_p8)
}
 0x1f4   :  { %s1275_s23 = scalar_lea.hbm %s2589_s5, 128 }
 0x1f5   :  { %p1276_p9 = scmp.ne.s32.totalorder %s2589_s5, %s1275_s23  ;;  %p1279_p10 = scmp.lt.u32.totalorder %s1275_s23, %s2589_s5 }
 0x1f7   :  { %p1281_p11 = pnand %p1279_p10, %p1276_p9 }
 0x1f9   :  { %1284 = shalt.err (!%p1281_p11)
}
 0x1fa   :  { %1078 = dma.vmem_to_hbm [thread:$0]  %s1076_s18, 128, %s2589_s5, [#allocation10]  }
 0x1fb   :  { %1289 = dma.done.wait [#allocation4], 1024  }
 0x1fc   :  { %1290 = vsyncadd [#allocation4], 4294966272 }
 0x1fd   :  { %1291 = dma.done.wait [#allocation10], 128  }
 0x1fe   :  { %1292 = vsyncadd [#allocation10], 4294967168 }
 0x1ff   :  { %1085 = vsyncpa [#allocation3], 1 }
 0x200   :  { %1086 = vsyncpa [#allocation6], 1 }
 0x201   :  { %1087 = vsyncpa [#allocation4], 1 }
 0x202   :  { %1088 = vsyncpa [#allocation10], 1 }

</bundles_post_ra>
